<compile_context>
chip_gen: v6e
topology: v6e:2x2x1
jax: 0.10.0
libtpu: 0.0.40
codegen_flags: <defaults>
</compile_context>

<pallas_src>
import functools
import math

import jax
import jax.numpy as jnp
from jax import lax
from jax.experimental import pallas as pl
from jax.experimental.pallas import tpu as pltpu


def _round_up(v, m):
    return (v + m - 1) // m * m


def _tpu_defaults():
    """Generation-aware VMEM budget / bf16-VALU availability (safe fallbacks)."""
    try:
        kind = jax.devices()[0].device_kind.lower()
    except Exception:  # pragma: no cover - defensive
        kind = ""
    if "v5 lite" in kind or "v5e" in kind or "v5lite" in kind:
        return dict(vmem_bytes=128 << 20, bf16_valu=False)       # v5e: no bf16 VALU
    if "v6" in kind:
        return dict(vmem_bytes=128 << 20, bf16_valu=True)
    if "v7" in kind or "7x" in kind:
        return dict(vmem_bytes=64 << 20, bf16_valu=True)
    # Unknown / future chip: conservative (v7x-like) VMEM, assume bf16 VALU.
    return dict(vmem_bytes=64 << 20, bf16_valu=True)


def _sep_conv_kernel(x_main_ref, x_halo_ref, wdw_ref, wpw_ref, bias_ref, o_ref,
                     band_ref, dw_ref, *, k, tile_h, rb, w_al, tap_bf16):
    """One grid step = one (batch, H-tile) output block.

    x_main_ref : (1, TH,  Wp, Cp)    bf16  rows [t*TH, t*TH+TH) of the padded input
    x_halo_ref : (1, 2p,  Wp, Cp)    bf16  the 2p rows just below the main block
    wdw_ref    : (k*k, Cp)           f32   depthwise weights * depthwise-BN scale
    wpw_ref    : (Cp, Coutp)         bf16  pointwise weights * pointwise-BN scale
    bias_ref   : (1, Coutp)          f32   total folded bias (conv biases + both BNs)
    o_ref      : (1, TH, W_al, Coutp) bf16
    band_ref   : (TH+2p, Wp, Cp)     bf16  VMEM scratch: main + halo assembled band
    dw_ref     : (TH, W_al, Cp)      bf16  VMEM scratch: depthwise result (MXU LHS)
    """
    p = (k - 1) // 2
    halo = 2 * p
    cp = band_ref.shape[2]
    coutp = o_ref.shape[3]

    # Assemble the (TH + 2p)-row input band once (halo handling for the H tiling).
    # TODO(synk): an overlapping pl.Element-offset input window would drop this
    # VMEM->VMEM copy entirely.
    band_ref[0:tile_h, :, :] = x_main_ref[0]
    band_ref[tile_h:tile_h + halo, :, :] = x_halo_ref[0]

    wdw_f32 = wdw_ref[...]                          # (k*k, Cp) f32, hoisted
    wdw_bf16 = wdw_f32.astype(jnp.bfloat16)

    n_sub = tile_h // rb

    # Register-blocked depthwise conv: per rb-row sub-block the full k^2-tap sum is
    # built in vregs (f32) and written exactly once, as bf16, into the MXU LHS.
    # TODO(synk): use pltpu.roll along W (XLU slot) for the dx shifts instead of the
    # sublane-unaligned register slices.
    @pl.loop(0, n_sub)
    def _(s):
        row0 = pl.multiple_of(s * rb, rb)
        sub = band_ref[pl.ds(row0, rb + halo), :, :]          # (rb+2p, Wp, Cp) bf16
        acc = jnp.zeros((rb, w_al, cp), jnp.float32)
        for dy in range(k):
            for dx in range(k):
                tap = sub[dy:dy + rb, dx:dx + w_al, :]        # (rb, W_al, Cp) bf16
                if tap_bf16:
                    # bf16 multiply (v6e/v7x bf16 VALU), f32 accumulation.
                    acc = acc + (tap * wdw_bf16[dy * k + dx]).astype(jnp.float32)
                else:
                    # v5e: no bf16 VALU -> f32 multiply / accumulate.
                    acc = acc + tap.astype(jnp.float32) * wdw_f32[dy * k + dx]
        dw_ref[pl.ds(row0, rb), :, :] = acc.astype(jnp.bfloat16)   # write-once

    # Pointwise 1x1 conv == one MXU matmul over the whole tile (M = TH*W_al,
    # W_al multiple of 16 -> the (TH, W_al) merge is a layout no-op).
    lhs = dw_ref[...].reshape(tile_h * w_al, cp)
    y = jnp.dot(lhs, wpw_ref[...], preferred_element_type=jnp.float32)

    # Single folded bias (conv biases + both BN affines), then ReLU6.
    y = jnp.clip(y + bias_ref[...], 0.0, 6.0)
    o_ref[...] = y.reshape(1, tile_h, w_al, coutp).astype(o_ref.dtype)


def separable_conv_bn_relu(x, kparams, *, k, tile_h=None, data_format="NCHW"):
    """Fused SeparableConvBNReLU forward (eval-mode BN).

    x: (N, C, H, W) for data_format="NCHW" (PyTorch layout) or (N, H, W, C).
    kparams: dict produced by fold_and_pack_params().
    """
    assert k % 2 == 1 and k >= 3, "stride-1, odd kernel_size >= 3 only"
    p = (k - 1) // 2
    halo = 2 * p

    out_dtype = x.dtype
    if data_format == "NCHW":
        # TODO(synk): accepting NHWC end-to-end (data_format="NHWC") skips this HBM
        # round trip; kept here to match the PyTorch module's NCHW interface.
        x = jnp.transpose(x, (0, 2, 3, 1))
    n, h, w, c = x.shape
    cp = kparams["w_dw"].shape[1]
    coutp = kparams["w_pw"].shape[1]
    c_out = kparams["c_out"]
    assert c == kparams["c_in"]

    hw = _tpu_defaults()

    # Output width padded to a multiple of 16 -> all (TH, W) merges / bf16 stores
    # are sublane-aligned; padded input width includes the 'same' halo columns.
    w_al = _round_up(w, 16)
    w_pad = w_al + 2 * p

    # Register sub-block: rb rows x W_al x Cp f32 accumulator stays <= ~32 vregs.
    rb = max(1, min(8, (32 * 4096) // (w_al * cp * 4)))
    unit = (rb * halo) // math.gcd(rb, halo)        # tile_h must be a multiple

    auto_tile = tile_h is None
    if auto_tile:
        # Per-output-row VMEM cost: pipelined input block (+ band copy), dw scratch,
        # f32 matmul output intermediate and the double-buffered output block.
        per_row = (3 * w_pad * cp * 2 + w_al * cp * 2
                   + w_al * coutp * 4 + 2 * w_al * coutp * 2)
        budget = int(hw["vmem_bytes"] * 0.35)
        tile_h = max(unit, budget // max(per_row, 1))
    tile_h = min(tile_h, _round_up(h, unit))
    tile_h = max(unit, (tile_h // unit) * unit)
    if auto_tile:
        # v7x megacore: keep enough parallel grid steps for the 2 TensorCores.
        while n * pl.cdiv(h, tile_h) < 8 and tile_h > unit:
            tile_h = max(unit, ((tile_h // 2) // unit) * unit)
    # Halo BlockSpec addressing relies on these (see index_map below).
    assert tile_h % halo == 0 and tile_h % rb == 0, (tile_h, halo, rb)

    n_th = pl.cdiv(h, tile_h)
    h_pad = n_th * tile_h

    # One glue pass: bf16 cast + spatial 'same' pad + width/channel lane padding.
    xp = jnp.pad(x.astype(jnp.bfloat16),
                 ((0, 0), (p, h_pad - h + p), (p, (w_al - w) + p), (0, cp - c)))

    kernel = functools.partial(_sep_conv_kernel, k=k, tile_h=tile_h, rb=rb,
                               w_al=w_al, tap_bf16=hw["bf16_valu"])
    out = pl.pallas_call(
        kernel,
        out_shape=jax.ShapeDtypeStruct((n, h_pad, w_al, coutp), jnp.bfloat16),
        grid_spec=pltpu.PrefetchScalarGridSpec(
            num_scalar_prefetch=0,
            grid=(n, n_th),
            in_specs=[
                # main band: padded-input rows [t*TH, t*TH + TH)
                pl.BlockSpec((1, tile_h, w_pad, cp), lambda b, t: (b, t, 0, 0)),
                # bottom halo: the 2p rows right below the main band (same HBM array)
                pl.BlockSpec((1, halo, w_pad, cp),
                             lambda b, t: (b, (t + 1) * (tile_h // halo), 0, 0)),
                pl.BlockSpec((k * k, cp), lambda b, t: (0, 0)),
                pl.BlockSpec((cp, coutp), lambda b, t: (0, 0)),
                pl.BlockSpec((1, coutp), lambda b, t: (0, 0)),
            ],
            out_specs=pl.BlockSpec((1, tile_h, w_al, coutp),
                                   lambda b, t: (b, t, 0, 0)),
            scratch_shapes=[
                pltpu.VMEM((tile_h + halo, w_pad, cp), jnp.bfloat16),   # band
                pltpu.VMEM((tile_h, w_al, cp), jnp.bfloat16),           # dw / MXU LHS
            ],
        ),
        compiler_params=pltpu.CompilerParams(
            # every grid step writes a disjoint output block -> both axes parallel
            # (lets v7x megacore split N and/or the H tiles).
            dimension_semantics=("parallel", "parallel"),
            # 96 MiB on v5e/v6e (128 MiB physical), 48 MiB on v7x (64 MiB physical).
            vmem_limit_bytes=min(int(hw["vmem_bytes"] * 3 // 4), 96 << 20),
        ),
    )(xp, xp, kparams["w_dw"], kparams["w_pw"], kparams["bias"])

    out = out[:, :h, :w, :c_out].astype(out_dtype)
    if data_format == "NCHW":
        out = jnp.transpose(out, (0, 3, 1, 2))
    return out


def make_raw_params(key, c_in, c_out, k, eps=1e-5):
    """Deterministic synthetic parameters matching the PyTorch module (eval mode)."""
    ks = jax.random.split(key, 10)
    w_dw_t = jax.random.normal(ks[0], (c_in, 1, k, k), jnp.float32) * 0.2   # depthwise Conv2d
    b_dw_conv = jax.random.normal(ks[1], (c_in,), jnp.float32) * 0.1
    g1 = 1.0 + 0.1 * jax.random.normal(ks[2], (c_in,), jnp.float32)         # BN1
    be1 = 0.1 * jax.random.normal(ks[3], (c_in,), jnp.float32)
    m1 = 0.05 * jax.random.normal(ks[4], (c_in,), jnp.float32)
    v1 = 1.0 + 0.1 * jax.random.uniform(ks[5], (c_in,), jnp.float32)
    w_pw_t = jax.random.normal(ks[6], (c_out, c_in, 1, 1), jnp.float32) * 0.2  # 1x1 Conv2d
    b_pw_conv = jax.random.normal(ks[7], (c_out,), jnp.float32) * 0.1
    g2 = 1.0 + 0.1 * jax.random.normal(ks[8], (c_out,), jnp.float32)           # BN2
    be2 = 0.1 * jax.random.normal(ks[9], (c_out,), jnp.float32)
    m2 = jnp.zeros((c_out,), jnp.float32)
    v2 = jnp.ones((c_out,), jnp.float32)
    return dict(w_dw_t=w_dw_t, b_dw_conv=b_dw_conv, g1=g1, be1=be1, m1=m1, v1=v1,
                w_pw_t=w_pw_t, b_pw_conv=b_pw_conv, g2=g2, be2=be2, m2=m2, v2=v2,
                eps=eps)


def fold_and_pack_params(raw, k):
    """Fold conv biases + eval-mode BN into the weights / one bias, pad channels to
    lane-dense multiples of 128, and lay out for the kernel."""
    eps = raw["eps"]
    c_in = raw["w_dw_t"].shape[0]
    c_out = raw["w_pw_t"].shape[0]
    s1 = raw["g1"] / jnp.sqrt(raw["v1"] + eps)                 # depthwise BN scale
    b1 = raw["be1"] + (raw["b_dw_conv"] - raw["m1"]) * s1      # depthwise total bias
    s2 = raw["g2"] / jnp.sqrt(raw["v2"] + eps)                 # pointwise BN scale
    b2 = raw["be2"] + (raw["b_pw_conv"] - raw["m2"]) * s2      # pointwise total bias

    # (k*k, C) row-major over (ky, kx), depthwise BN scale folded per channel.
    w_dw = jnp.transpose(raw["w_dw_t"][:, 0], (1, 2, 0)).reshape(k * k, c_in) * s1
    # (C, Cout), pointwise BN scale folded per output channel.
    w_pw = jnp.transpose(raw["w_pw_t"][:, :, 0, 0], (1, 0)) * s2[None, :]
    # Depthwise bias folded through the pointwise conv -> one bias after the matmul.
    bias = b2 + b1 @ w_pw

    cp = _round_up(c_in, 128)
    coutp = _round_up(c_out, 128)
    # TODO(synk): pad to 256 multiples on v6e/v7x when channels already exceed 256
    # (2x256x256 MXU); 128 multiples kept for simplicity / v5e.
    w_dw_p = jnp.zeros((k * k, cp), jnp.float32).at[:, :c_in].set(w_dw)
    w_pw_p = jnp.zeros((cp, coutp), jnp.float32).at[:c_in, :c_out].set(w_pw)
    bias_p = jnp.zeros((1, coutp), jnp.float32).at[0, :c_out].set(bias)
    return dict(w_dw=w_dw_p,
                w_pw=w_pw_p.astype(jnp.bfloat16),
                bias=bias_p,
                c_in=c_in, c_out=c_out)


def reference_forward(x_nchw, raw, k):
    """Pure-JAX f32 reference (lax.conv) of the PyTorch forward in eval mode."""
    n, c, h, w = x_nchw.shape
    eps = raw["eps"]
    x = jnp.transpose(x_nchw, (0, 2, 3, 1))                           # NHWC
    w_dw_hwio = jnp.transpose(raw["w_dw_t"], (2, 3, 1, 0))            # (k,k,1,C)
    y = lax.conv_general_dilated(
        x, w_dw_hwio, (1, 1), "SAME",
        dimension_numbers=("NHWC", "HWIO", "NHWC"), feature_group_count=c)
    y = y + raw["b_dw_conv"]
    y = raw["g1"] * (y - raw["m1"]) / jnp.sqrt(raw["v1"] + eps) + raw["be1"]
    w_pw = jnp.transpose(raw["w_pw_t"][:, :, 0, 0], (1, 0))           # (C, Cout)
    z = jnp.einsum("nhwc,co->nhwo", y, w_pw) + raw["b_pw_conv"]
    z = raw["g2"] * (z - raw["m2"]) / jnp.sqrt(raw["v2"] + eps) + raw["be2"]
    z = jnp.clip(z, 0.0, 6.0)
    return jnp.transpose(z, (0, 3, 1, 2))                             # NCHW


if __name__ == "__main__":
    N, C, H, W = 2, 4, 16, 16
    COUT, K = 8, 3

    key = jax.random.PRNGKey(0)
    kx, kp = jax.random.split(key)
    x = jax.random.normal(kx, (N, C, H, W), jnp.float32)

    raw = make_raw_params(kp, C, COUT, K)
    kparams = fold_and_pack_params(raw, K)

    # tile_h=8 -> grid=(N, 2): exercises the H tiling, halo index maps and the
    # register-blocked sub-block loop.
    out = separable_conv_bn_relu(x, kparams, k=K, tile_h=8)
    out = jax.block_until_ready(out)

    ref = jax.block_until_ready(reference_forward(x, raw, K))
    assert out.shape == (N, COUT, H, W), out.shape
    err = float(jnp.max(jnp.abs(out - ref)))
    # bf16 activation stream, bf16 tap products and bf16 MXU operands vs. pure-f32
    # reference -> inference-grade tolerance.
    assert err < 1e-1, f"max abs err too high: {err}"
    print("KERNEL_OK")
</pallas_src>

<mosaic_0001>
module attributes {stable_mosaic.version = 11 : i64} {
  func.func @_sep_conv_kernel(%arg0: i32, %arg1: i32, %arg2: memref<1x8x18x128xbf16, #tpu.memory_space<vmem>>, %arg3: memref<1x2x18x128xbf16, #tpu.memory_space<vmem>>, %arg4: memref<9x128xf32, #tpu.memory_space<vmem>>, %arg5: memref<128x128xbf16, #tpu.memory_space<vmem>>, %arg6: memref<1x128xf32, #tpu.memory_space<vmem>>, %arg7: memref<1x8x16x128xbf16, #tpu.memory_space<vmem>>, %arg8: memref<10x18x128xbf16, #tpu.memory_space<vmem>>, %arg9: memref<8x16x128xbf16, #tpu.memory_space<vmem>>) attributes {dimension_semantics = [#tpu.dimension_semantics<parallel>, #tpu.dimension_semantics<parallel>], iteration_bounds = array<i64: 2, 2>, scalar_prefetch = 0 : i64, scratch_operands = 2 : i64, tpu.core_type = #tpu.core_type<tc>, window_params = [{transform_indices = @transform_0, window_bounds = array<i64: 1, 8, 18, 128>}, {transform_indices = @transform_1, window_bounds = array<i64: 1, 2, 18, 128>}, {pipeline_mode = #tpu.pipeline_mode<synchronous>, transform_indices = @transform_2, window_bounds = array<i64: 9, 128>}, {pipeline_mode = #tpu.pipeline_mode<synchronous>, transform_indices = @transform_3, window_bounds = array<i64: 128, 128>}, {pipeline_mode = #tpu.pipeline_mode<synchronous>, transform_indices = @transform_4, window_bounds = array<i64: 1, 128>}, {transform_indices = @transform_5, window_bounds = array<i64: 1, 8, 16, 128>}]} {
    %c0 = arith.constant 0 : index
    %c0_0 = arith.constant 0 : index
    %c0_1 = arith.constant 0 : index
    %c0_2 = arith.constant 0 : index
    %0 = vector.load %arg2[%c0, %c0_0, %c0_1, %c0_2] : memref<1x8x18x128xbf16, #tpu.memory_space<vmem>>, vector<1x8x18x128xbf16>
    %1 = vector.shape_cast %0 : vector<1x8x18x128xbf16> to vector<8x18x128xbf16>
    %c0_3 = arith.constant 0 : index
    %c0_4 = arith.constant 0 : index
    %c0_5 = arith.constant 0 : index
    %2 = vector.load %arg8[%c0_3, %c0_4, %c0_5] : memref<10x18x128xbf16, #tpu.memory_space<vmem>>, vector<8x18x128xbf16>
    tpu.vector_store %arg8[%c0_3, %c0_4, %c0_5], %1 {strides = array<i32>} : memref<10x18x128xbf16, #tpu.memory_space<vmem>>, vector<8x18x128xbf16>,
    %c0_6 = arith.constant 0 : index
    %c0_7 = arith.constant 0 : index
    %c0_8 = arith.constant 0 : index
    %c0_9 = arith.constant 0 : index
    %3 = vector.load %arg3[%c0_6, %c0_7, %c0_8, %c0_9] : memref<1x2x18x128xbf16, #tpu.memory_space<vmem>>, vector<1x2x18x128xbf16>
    %4 = vector.shape_cast %3 : vector<1x2x18x128xbf16> to vector<2x18x128xbf16>
    %c8 = arith.constant 8 : index
    %c0_10 = arith.constant 0 : index
    %c0_11 = arith.constant 0 : index
    %5 = vector.load %arg8[%c8, %c0_10, %c0_11] : memref<10x18x128xbf16, #tpu.memory_space<vmem>>, vector<2x18x128xbf16>
    tpu.vector_store %arg8[%c8, %c0_10, %c0_11], %4 {strides = array<i32>} : memref<10x18x128xbf16, #tpu.memory_space<vmem>>, vector<2x18x128xbf16>,
    %c0_12 = arith.constant 0 : index
    %c0_13 = arith.constant 0 : index
    %6 = vector.load %arg4[%c0_12, %c0_13] : memref<9x128xf32, #tpu.memory_space<vmem>>, vector<9x128xf32>
    %7 = arith.truncf %6 : vector<9x128xf32> to vector<9x128xbf16>
    %c0_i32 = arith.constant 0 : i32
    %c1_i32 = arith.constant 1 : i32
    %8 = arith.muli %c0_i32, %c1_i32 : i32
    %c0_i32_14 = arith.constant 0 : i32
    %9 = arith.addi %c0_i32_14, %8 : i32
    %c8_i32 = arith.constant 8 : i32
    %10 = arith.muli %9, %c8_i32 : i32
    %11 = tpu.assume_multiple %10, 8 : i32
    %12 = arith.index_cast %11 : i32 to index
    %c0_15 = arith.constant 0 : index
    %c0_16 = arith.constant 0 : index
    %13 = vector.load %arg8[%12, %c0_15, %c0_16] : memref<10x18x128xbf16, #tpu.memory_space<vmem>>, vector<10x18x128xbf16>
    %cst = arith.constant 0.000000e+00 : f32
    %14 = vector.broadcast %cst : f32 to vector<8x16x128xf32>
    %15 = vector.extract_strided_slice %13 {offsets = [0, 0, 0], sizes = [8, 16, 128], strides = [1, 1, 1]} : vector<10x18x128xbf16> to vector<8x16x128xbf16>
    %16 = vector.extract_strided_slice %7 {offsets = [0, 0], sizes = [1, 128], strides = [1, 1]} : vector<9x128xbf16> to vector<1x128xbf16>
    %17 = vector.shape_cast %16 : vector<1x128xbf16> to vector<128xbf16>
    %18 = vector.shape_cast %17 : vector<128xbf16> to vector<1x1x128xbf16>
    %19 = vector.broadcast %18 : vector<1x1x128xbf16> to vector<8x16x128xbf16>
    %20 = arith.mulf %15, %19 : vector<8x16x128xbf16>
    %21 = arith.extf %20 : vector<8x16x128xbf16> to vector<8x16x128xf32>
    %22 = arith.addf %14, %21 : vector<8x16x128xf32>
    %23 = vector.extract_strided_slice %13 {offsets = [0, 1, 0], sizes = [8, 16, 128], strides = [1, 1, 1]} : vector<10x18x128xbf16> to vector<8x16x128xbf16>
    %24 = vector.extract_strided_slice %7 {offsets = [1, 0], sizes = [1, 128], strides = [1, 1]} : vector<9x128xbf16> to vector<1x128xbf16>
    %25 = vector.shape_cast %24 : vector<1x128xbf16> to vector<128xbf16>
    %26 = vector.shape_cast %25 : vector<128xbf16> to vector<1x1x128xbf16>
    %27 = vector.broadcast %26 : vector<1x1x128xbf16> to vector<8x16x128xbf16>
    %28 = arith.mulf %23, %27 : vector<8x16x128xbf16>
    %29 = arith.extf %28 : vector<8x16x128xbf16> to vector<8x16x128xf32>
    %30 = arith.addf %22, %29 : vector<8x16x128xf32>
    %31 = vector.extract_strided_slice %13 {offsets = [0, 2, 0], sizes = [8, 16, 128], strides = [1, 1, 1]} : vector<10x18x128xbf16> to vector<8x16x128xbf16>
    %32 = vector.extract_strided_slice %7 {offsets = [2, 0], sizes = [1, 128], strides = [1, 1]} : vector<9x128xbf16> to vector<1x128xbf16>
    %33 = vector.shape_cast %32 : vector<1x128xbf16> to vector<128xbf16>
    %34 = vector.shape_cast %33 : vector<128xbf16> to vector<1x1x128xbf16>
    %35 = vector.broadcast %34 : vector<1x1x128xbf16> to vector<8x16x128xbf16>
    %36 = arith.mulf %31, %35 : vector<8x16x128xbf16>
    %37 = arith.extf %36 : vector<8x16x128xbf16> to vector<8x16x128xf32>
    %38 = arith.addf %30, %37 : vector<8x16x128xf32>
    %39 = vector.extract_strided_slice %13 {offsets = [1, 0, 0], sizes = [8, 16, 128], strides = [1, 1, 1]} : vector<10x18x128xbf16> to vector<8x16x128xbf16>
    %40 = vector.extract_strided_slice %7 {offsets = [3, 0], sizes = [1, 128], strides = [1, 1]} : vector<9x128xbf16> to vector<1x128xbf16>
    %41 = vector.shape_cast %40 : vector<1x128xbf16> to vector<128xbf16>
    %42 = vector.shape_cast %41 : vector<128xbf16> to vector<1x1x128xbf16>
    %43 = vector.broadcast %42 : vector<1x1x128xbf16> to vector<8x16x128xbf16>
    %44 = arith.mulf %39, %43 : vector<8x16x128xbf16>
    %45 = arith.extf %44 : vector<8x16x128xbf16> to vector<8x16x128xf32>
    %46 = arith.addf %38, %45 : vector<8x16x128xf32>
    %47 = vector.extract_strided_slice %13 {offsets = [1, 1, 0], sizes = [8, 16, 128], strides = [1, 1, 1]} : vector<10x18x128xbf16> to vector<8x16x128xbf16>
    %48 = vector.extract_strided_slice %7 {offsets = [4, 0], sizes = [1, 128], strides = [1, 1]} : vector<9x128xbf16> to vector<1x128xbf16>
    %49 = vector.shape_cast %48 : vector<1x128xbf16> to vector<128xbf16>
    %50 = vector.shape_cast %49 : vector<128xbf16> to vector<1x1x128xbf16>
    %51 = vector.broadcast %50 : vector<1x1x128xbf16> to vector<8x16x128xbf16>
    %52 = arith.mulf %47, %51 : vector<8x16x128xbf16>
    %53 = arith.extf %52 : vector<8x16x128xbf16> to vector<8x16x128xf32>
    %54 = arith.addf %46, %53 : vector<8x16x128xf32>
    %55 = vector.extract_strided_slice %13 {offsets = [1, 2, 0], sizes = [8, 16, 128], strides = [1, 1, 1]} : vector<10x18x128xbf16> to vector<8x16x128xbf16>
    %56 = vector.extract_strided_slice %7 {offsets = [5, 0], sizes = [1, 128], strides = [1, 1]} : vector<9x128xbf16> to vector<1x128xbf16>
    %57 = vector.shape_cast %56 : vector<1x128xbf16> to vector<128xbf16>
    %58 = vector.shape_cast %57 : vector<128xbf16> to vector<1x1x128xbf16>
    %59 = vector.broadcast %58 : vector<1x1x128xbf16> to vector<8x16x128xbf16>
    %60 = arith.mulf %55, %59 : vector<8x16x128xbf16>
    %61 = arith.extf %60 : vector<8x16x128xbf16> to vector<8x16x128xf32>
    %62 = arith.addf %54, %61 : vector<8x16x128xf32>
    %63 = vector.extract_strided_slice %13 {offsets = [2, 0, 0], sizes = [8, 16, 128], strides = [1, 1, 1]} : vector<10x18x128xbf16> to vector<8x16x128xbf16>
    %64 = vector.extract_strided_slice %7 {offsets = [6, 0], sizes = [1, 128], strides = [1, 1]} : vector<9x128xbf16> to vector<1x128xbf16>
    %65 = vector.shape_cast %64 : vector<1x128xbf16> to vector<128xbf16>
    %66 = vector.shape_cast %65 : vector<128xbf16> to vector<1x1x128xbf16>
    %67 = vector.broadcast %66 : vector<1x1x128xbf16> to vector<8x16x128xbf16>
    %68 = arith.mulf %63, %67 : vector<8x16x128xbf16>
    %69 = arith.extf %68 : vector<8x16x128xbf16> to vector<8x16x128xf32>
    %70 = arith.addf %62, %69 : vector<8x16x128xf32>
    %71 = vector.extract_strided_slice %13 {offsets = [2, 1, 0], sizes = [8, 16, 128], strides = [1, 1, 1]} : vector<10x18x128xbf16> to vector<8x16x128xbf16>
    %72 = vector.extract_strided_slice %7 {offsets = [7, 0], sizes = [1, 128], strides = [1, 1]} : vector<9x128xbf16> to vector<1x128xbf16>
    %73 = vector.shape_cast %72 : vector<1x128xbf16> to vector<128xbf16>
    %74 = vector.shape_cast %73 : vector<128xbf16> to vector<1x1x128xbf16>
    %75 = vector.broadcast %74 : vector<1x1x128xbf16> to vector<8x16x128xbf16>
    %76 = arith.mulf %71, %75 : vector<8x16x128xbf16>
    %77 = arith.extf %76 : vector<8x16x128xbf16> to vector<8x16x128xf32>
    %78 = arith.addf %70, %77 : vector<8x16x128xf32>
    %79 = vector.extract_strided_slice %13 {offsets = [2, 2, 0], sizes = [8, 16, 128], strides = [1, 1, 1]} : vector<10x18x128xbf16> to vector<8x16x128xbf16>
    %80 = vector.extract_strided_slice %7 {offsets = [8, 0], sizes = [1, 128], strides = [1, 1]} : vector<9x128xbf16> to vector<1x128xbf16>
    %81 = vector.shape_cast %80 : vector<1x128xbf16> to vector<128xbf16>
    %82 = vector.shape_cast %81 : vector<128xbf16> to vector<1x1x128xbf16>
    %83 = vector.broadcast %82 : vector<1x1x128xbf16> to vector<8x16x128xbf16>
    %84 = arith.mulf %79, %83 : vector<8x16x128xbf16>
    %85 = arith.extf %84 : vector<8x16x128xbf16> to vector<8x16x128xf32>
    %86 = arith.addf %78, %85 : vector<8x16x128xf32>
    %87 = arith.truncf %86 : vector<8x16x128xf32> to vector<8x16x128xbf16>
    %88 = arith.index_cast %11 : i32 to index
    %c0_17 = arith.constant 0 : index
    %c0_18 = arith.constant 0 : index
    %89 = vector.load %arg9[%88, %c0_17, %c0_18] : memref<8x16x128xbf16, #tpu.memory_space<vmem>>, vector<8x16x128xbf16>
    tpu.vector_store %arg9[%88, %c0_17, %c0_18], %87 {strides = array<i32>} : memref<8x16x128xbf16, #tpu.memory_space<vmem>>, vector<8x16x128xbf16>,
    %c1_i32_19 = arith.constant 1 : i32
    %c0_20 = arith.constant 0 : index
    %c0_21 = arith.constant 0 : index
    %c0_22 = arith.constant 0 : index
    %90 = vector.load %arg9[%c0_20, %c0_21, %c0_22] : memref<8x16x128xbf16, #tpu.memory_space<vmem>>, vector<8x16x128xbf16>
    %91 = vector.shape_cast %90 : vector<8x16x128xbf16> to vector<128x128xbf16>
    %c0_23 = arith.constant 0 : index
    %c0_24 = arith.constant 0 : index
    %92 = vector.load %arg5[%c0_23, %c0_24] : memref<128x128xbf16, #tpu.memory_space<vmem>>, vector<128x128xbf16>
    %cst_25 = arith.constant dense<0.000000e+00> : vector<128x128xf32>
    %93 = tpu.matmul %91, %92, %cst_25 {dimension_numbers = #tpu.dot_dimension_numbers<[1], [0], [0], [1], [0, 0, 1, 1], [], []>} : vector<128x128xbf16>, vector<128x128xbf16>, vector<128x128xf32> -> vector<128x128xf32>
    %c0_26 = arith.constant 0 : index
    %c0_27 = arith.constant 0 : index
    %94 = vector.load %arg6[%c0_26, %c0_27] : memref<1x128xf32, #tpu.memory_space<vmem>>, vector<1x128xf32>
    %95 = vector.broadcast %94 : vector<1x128xf32> to vector<128x128xf32>
    %96 = arith.addf %93, %95 : vector<128x128xf32>
    %cst_28 = arith.constant 0.000000e+00 : f32
    %cst_29 = arith.constant 6.000000e+00 : f32
    %97 = vector.broadcast %cst_28 : f32 to vector<128x128xf32>
    %98 = arith.maximumf %97, %96 : vector<128x128xf32>
    %99 = vector.broadcast %cst_29 : f32 to vector<128x128xf32>
    %100 = arith.minimumf %99, %98 : vector<128x128xf32>
    %101 = vector.shape_cast %100 : vector<128x128xf32> to vector<1x8x16x128xf32>
    %102 = arith.truncf %101 : vector<1x8x16x128xf32> to vector<1x8x16x128xbf16>
    %c0_30 = arith.constant 0 : index
    %c0_31 = arith.constant 0 : index
    %c0_32 = arith.constant 0 : index
    %c0_33 = arith.constant 0 : index
    %103 = vector.load %arg7[%c0_30, %c0_31, %c0_32, %c0_33] : memref<1x8x16x128xbf16, #tpu.memory_space<vmem>>, vector<1x8x16x128xbf16>
    tpu.vector_store %arg7[%c0_30, %c0_31, %c0_32, %c0_33], %102 {strides = array<i32>} : memref<1x8x16x128xbf16, #tpu.memory_space<vmem>>, vector<1x8x16x128xbf16>,
    return
  }
  func.func @transform_0(%arg0: i32, %arg1: i32) -> (i32, i32, i32, i32) {
    %c0_i32 = arith.constant 0 : i32
    %c0_i32_0 = arith.constant 0 : i32
    %c0_i32_1 = arith.constant 0 : i32
    return %arg0, %arg1, %c0_i32, %c0_i32_0 : i32, i32, i32, i32
  }
  func.func @transform_1(%arg0: i32, %arg1: i32) -> (i32, i32, i32, i32) {
    %c1_i32 = arith.constant 1 : i32
    %0 = arith.addi %arg1, %c1_i32 : i32
    %c4_i32 = arith.constant 4 : i32
    %1 = arith.muli %0, %c4_i32 : i32
    %c0_i32 = arith.constant 0 : i32
    %c0_i32_0 = arith.constant 0 : i32
    %c0_i32_1 = arith.constant 0 : i32
    return %arg0, %1, %c0_i32, %c0_i32_0 : i32, i32, i32, i32
  }
  func.func @transform_2(%arg0: i32, %arg1: i32) -> (i32, i32) {
    %c0_i32 = arith.constant 0 : i32
    %c0_i32_0 = arith.constant 0 : i32
    %c0_i32_1 = arith.constant 0 : i32
    return %c0_i32, %c0_i32_0 : i32, i32
  }
  func.func @transform_3(%arg0: i32, %arg1: i32) -> (i32, i32) {
    %c0_i32 = arith.constant 0 : i32
    %c0_i32_0 = arith.constant 0 : i32
    %c0_i32_1 = arith.constant 0 : i32
    return %c0_i32, %c0_i32_0 : i32, i32
  }
  func.func @transform_4(%arg0: i32, %arg1: i32) -> (i32, i32) {
    %c0_i32 = arith.constant 0 : i32
    %c0_i32_0 = arith.constant 0 : i32
    %c0_i32_1 = arith.constant 0 : i32
    return %c0_i32, %c0_i32_0 : i32, i32
  }
  func.func @transform_5(%arg0: i32, %arg1: i32) -> (i32, i32, i32, i32) {
    %c0_i32 = arith.constant 0 : i32
    %c0_i32_0 = arith.constant 0 : i32
    %c0_i32_1 = arith.constant 0 : i32
    return %arg0, %arg1, %c0_i32, %c0_i32_0 : i32, i32, i32, i32
  }
}

</mosaic_0001>

<bundles_post_ra>
// kernel: tpu_custom_call.1
= control target key start
LH: loop header
LB: loop body
LE: loop exit
PB: predicated region body
PF: predicated region fallthrough
CT: control target
= control target key end

     0   :  { %10 = vsyncpa [#allocation5], 0  ;;  %s3361_s0 = inlined_call_operand.vmem [shape: bf16[2,18,18,128], index: 0, kind: input, shape index: {}]   ;;  %s3362_s1 = inlined_call_operand.vmem [shape: bf16[2,18,18,128], index: 1, kind: input, shape index: {}]   ;;  %s3363_s2 = inlined_call_operand.vmem [shape: f32[9,128], index: 2, kind: input, shape index: {}]   ;;  %s3364_s3 = inlined_call_operand.vmem [shape: bf16[128,128], index: 3, kind: input, shape index: {}]   ;;  %s3365_s4 = inlined_call_operand.vmem [shape: f32[1,128], index: 4, kind: input, shape index: {}]   ;;  %s3366_s5 = inlined_call_operand.hbm [shape: bf16[2,16,16,128], index: 5, kind: output, shape index: {}]  }
   0x1   :  { %12 = vsyncpa [#allocation5 + $0x1], 0  ;;  %s2574_s18 = smov 0   ;;  %s2576_s19 = smov 0  }
   0x2   :  { %s2578_s20 = smov 0   ;;  %s2580_s21 = smov 0  }
   0x3   :  { %s2582_s22 = smov 0   ;;  %s2584_s23 = smov 0  }
   0x4   :  { %s2586_s24 = smov 0   ;;  %s2588_s25 = smov 0  }
   0x5 LB: > { %s2071_s26 = sadd.s32 4294967295, %s2539_s25   ;;  %s2072_s27 = sadd.s32 4294967294, %s2539_s25   ;;  %s2539_s25 = sphi %s2588_s25, %s18_s25   ;;  %s2535_s24 = sphi %s2586_s24, %s3382_s24   ;;  %s2531_s23 = sphi %s2584_s23, %s3381_s23   ;;  %s2527_s22 = sphi %s2582_s22, %s3380_s22   ;;  %s2523_s21 = sphi %s2580_s21, %s3379_s21   ;;  %s2519_s20 = sphi %s2578_s20, %s3378_s20   ;;  %s2515_s19 = sphi %s2576_s19, %s3377_s19   ;;  %s2511_s18 = sphi %s2574_s18, %s3376_s18  }
   0x6   : > { %s27_s28 = sadd.s32 1, %s2531_s23  ;;  %s30_s29 = sadd.s32 1, %s2535_s24 }
   0x7   : > { %p28_p0 = scmp.ge.s32.totalorder %s27_s28, 2  ;;  %p172_p1 = scmp.ne.s32.totalorder %s2519_s20, %s2515_s19 }
   0x8   : > { %p173_p2 = scmp.eq.s32.totalorder %s2071_s26, 3  ;;  %p178_p5 = scmp.ne.s32.totalorder %s2515_s19, %s2511_s18 }
   0x9   : > { %s3384_s28 = smov (%p28_p0, %s27_s28), 0  ;;  %s3386_s29 = smov (!%p28_p0, %s30_s29), %s2535_s24 }
   0xa   : > { %3369 = sst [smem:[#allocation7_spill]] %s3384_s28  ;;  %s158_s30 = ssub.s32 %s2531_s23, %s3384_s28 }
   0xb   : > { %p2625_p3 = por %p173_p2, %p172_p1  ;;  %p32_p4 = scmp.ge.s32.totalorder %s3386_s29, 2 }
   0xc   : > { %p179_p6 = scmp.eq.s32.totalorder %s2072_s27, 3  ;;  %p2077_p7 = scmp.ge.s32.totalorder %s2539_s25, 1 }
   0xd   : > { %s3388_s29 = smov (%p32_p4, %s3386_s29), 0  ;;  %p248_p9 = scmp.lt.s32.totalorder %s2539_s25, 5 }
   0xe   : > { %3371 = sst [smem:[#allocation8_spill]] %s3388_s29  ;;  %p2634_p8 = por %p179_p6, %p178_p5 }
   0xf   : > { %s157_s8 = ssub.s32 %s2535_s24, %s3388_s29  ;;  %s162_s9 = sadd.s32 1, %s2519_s20 }
  0x10   : > { %s159_s10 = sor.u32 %s158_s30, %s157_s8  ;;  %p249_p10 = pnand %p2077_p7, %p248_p9 }
  0x11   : > { %p160_p11 = scmp.eq.s32.totalorder %s159_s10, 0  ;;  %s2649_s14 = sshll.u32 (!%p249_p10), %s2523_s21, 3 }
  0x12   : > { %252 = sbr.rel (%p249_p10) target bundleno = 466 (0x1d2), region = 40  ;;  %p304_p12 = scmp.lt.s32.totalorder (!%p249_p10), %s2527_s22, 1 }
  0x13   : > { %s2643_s11 = scalar_select %p160_p11, %s2519_s20, %s162_s9  }
  0x14   : > { %p306_p13 = scmp.lt.s32.totalorder (!%p249_p10), %s2649_s14, 17 }
  0x17   : > { %v2425_v0 = vld [vmem:[%s3364_s3 + $0x38] sm:$0xff]   ;;  %v2426_v1 = vld [vmem:[%s3364_s3 + $0x30] sm:$0xff]   ;;  %s2657_s17 = scalar_select %p304_p12, %s2527_s22, 1  ;;  %v436_v2 = vlaneseq  ;;  %v2427_v3 = vld [vmem:[%s3364_s3 + $0x28] sm:$0xff]   ;;  %vm575_vm0 = vcmask 1046528   ;;  %vm728_vm1 = vcmask 1045504  }
  0x18   : > { %2301 = vmatprep.subr.bf16.mxu0 %v2425_v0  ;;  %2333 = vmatprep.subr.bf16.mxu1 %v2425_v0  ;;  %s307_s30 = scalar_select %p306_p13, %s2649_s14, 17  ;;  %v2428_v5 = vld [vmem:[%s3364_s3 + $0x20] sm:$0xff]   ;;  %v398_v7 = vld [vmem:[%s3363_s2 + $0x8] sm:$0x1]  ;;  %v2686_v10 = vld [vmem:[%s3364_s3 + $0x18] sm:$0xff]  }
  0x19   : > { %2302 = vmatpush3.bf16.msra.mxu0 %v2425_v0  ;;  %2341 = vmatpush3.bf16.msra.mxu1 %v2425_v0  ;;  %s2350_s8 = smul.u32 54, %s2657_s17  ;;  %v2664_v4 = vshrl.u32 %v436_v2, 7  ;;  %v397_v6 = vld [vmem:[%s3363_s2] sm:$0xff]  ;;  %v2430_v39 = vld [vmem:[%s3364_s3 + $0x10] sm:$0xff]   ;;  %v2431_v58 = vld [vmem:[%s3364_s3 + $0x8] sm:$0xff]  }
  0x1a   : > { %2303 = vmatprep.subr.bf16.mxu0 %v2426_v1  ;;  %2334 = vmatprep.subr.bf16.mxu1 %v2426_v1  ;;  %s2349_s9 = smul.u32 3, %s307_s30  ;;  %s2270_s30 = sadd.s32 8, %s2649_s14  ;;  %v399_v8 = vpack.c.bf16 %v398_v7, %v397_v6 }
  0x1b   : > { %v650_v9 = vsub.s32 1, %v2664_v4  ;;  %p2679_p0 = scmp.lt.s32.totalorder %s2270_s30, 17  ;;  %v438_v11 = vsub.s32 0, %v2664_v4  ;;  %v859_v12 = vsub.s32 2, %v2664_v4  ;;  %v1163_v13 = vsub.s32 3, %v2664_v4 }
  0x1c   : > { %s310_s13 = sadd.s32 %s2350_s8, %s2349_s9  ;;  %v1371_v14 = vsub.s32 4, %v2664_v4  ;;  %v434_v18 = vpack.i.b16 %v399_v8, %v399_v8  ;;  %v492_v19 = vshrl.u32 %v399_v8, 16  ;;  %s2541_s9 = smov [#allocation4]  }
  0x1d   : > { %2304 = vmatpush3.bf16.msra.mxu0 %v2426_v1  ;;  %2342 = vmatpush3.bf16.msra.mxu1 %v2426_v1  ;;  %s2080_s29 = sshll.u32 %s310_s13, 2  ;;  %s3390_s30 = smov (!%p2679_p0, %s2270_s30), 17 }
  0x1e   : > { %2305 = vmatprep.subr.bf16.mxu0 %v2427_v3  ;;  %2335 = vmatprep.subr.bf16.mxu1 %v2427_v3  ;;  %s2691_s16 = scalar_lea.vmem %s3361_s0, %s2080_s29  ;;  %v439_v23 = vrot.slane %v434_v18, %v438_v11  ;;  %v493_v24 = vpack.i.b16 %v492_v19, %v492_v19  ;;  %v651_v25 = vrot.slane %v434_v18, %v650_v9  ;;  %s2351_s28 = smul.u32 3, %s3390_s30 }
  0x1f   : > { %v336_v15 = vld [vmem:[%s2691_s16] sm:$0xff]   ;;  %v338_v16 = vld [vmem:[%s2691_s16 + $0x8] sm:$0x1]  ;;  %v339_v17 = vld [vmem:[%s2691_s16 + $0xc] sm:$0xff]   ;;  %v860_v29 = vrot.slane %v434_v18, %v859_v12  ;;  %v1164_v30 = vrot.slane %v434_v18, %v1163_v13  ;;  %v1372_v31 = vrot.slane %v434_v18, %v1371_v14  ;;  %s2188_s13 = sshll.u32 %s2523_s21, 4  ;;  %s2451_s15 = sshll.u32 %s2541_s9, 4  ;;  %s2452_s15 = int_to_ptr.vmem [resolvable:$false] %s2451_s15 }
  0x20   : > { %v341_v20 = vld [vmem:[%s2691_s16 + $0x14] sm:$0x1]  ;;  %v342_v21 = vld [vmem:[%s2691_s16 + $0x18] sm:$0xff]   ;;  %v344_v22 = vld [vmem:[%s2691_s16 + $0x20] sm:$0x1]  ;;  %360 = vst [vmem:[#allocation2] sm:$0xff] %v336_v15   ;;  %v498_v35 = vrot.slane %v493_v24, %v438_v11  ;;  %s328_s29 = sadd.s32 %s2351_s28, %s2350_s8  ;;  %v2724_v40 = vcombine.low %v439_v23, %v439_v23  ;;  %v804_v41 = vrot.slane %v493_v24, %v650_v9  ;;  %v1012_v42 = vrot.slane %v493_v24, %v859_v12 }
  0x21   : > { %2306 = vmatpush3.bf16.msra.mxu0 %v2427_v3  ;;  %2343 = vmatpush3.bf16.msra.mxu1 %v2427_v3  ;;  %362 = vst [vmem:[#allocation2 + $0x8] sm:$0x1] %v338_v16  ;;  %363 = vst [vmem:[#allocation2 + $0xc] sm:$0xff] %v339_v17   ;;  %v348_v26 = vld [vmem:[%s2691_s16 + $0x30] sm:$0xff]   ;;  %v350_v27 = vld [vmem:[%s2691_s16 + $0x38] sm:$0x1]  ;;  %v2729_v45 = vcombine.low %v651_v25, %v651_v25  ;;  %v1220_v46 = vrot.slane %v493_v24, %v1163_v13 }
  0x22   : > { %2307 = vmatprep.subr.bf16.mxu0 %v2428_v5  ;;  %2336 = vmatprep.subr.bf16.mxu1 %v2428_v5  ;;  %365 = vst [vmem:[#allocation2 + $0x14] sm:$0x1] %v341_v20  ;;  %366 = vst [vmem:[#allocation2 + $0x18] sm:$0xff] %v342_v21   ;;  %v351_v28 = vld [vmem:[%s2691_s16 + $0x3c] sm:$0xff]   ;;  %v353_v32 = vld [vmem:[%s2691_s16 + $0x44] sm:$0x1]  ;;  %v2727_v44 = vcombine.low %v498_v35, %v498_v35  ;;  %v2736_v47 = vcombine.low %v860_v29, %v860_v29 }
  0x23   : > { %368 = vst [vmem:[#allocation2 + $0x20] sm:$0x1] %v344_v22  ;;  %v354_v33 = vld [vmem:[%s2691_s16 + $0x48] sm:$0xff]   ;;  %v356_v34 = vld [vmem:[%s2691_s16 + $0x50] sm:$0x1]  ;;  %372 = vst [vmem:[#allocation2 + $0x30] sm:$0xff] %v348_v26   ;;  %v2738_v48 = vcombine.low %v1164_v30, %v1164_v30  ;;  %v2740_v49 = vcombine.low %v1372_v31, %v1372_v31  ;;  %v2746_v55 = vcombine.low %v804_v41, %v804_v41 }
  0x24   : > { %374 = vst [vmem:[#allocation2 + $0x38] sm:$0x1] %v350_v27  ;;  %375 = vst [vmem:[#allocation2 + $0x3c] sm:$0xff] %v351_v28   ;;  %v345_v36 = vld [vmem:[%s2691_s16 + $0x24] sm:$0xff]   ;;  %v347_v37 = vld [vmem:[%s2691_s16 + $0x2c] sm:$0x1]  ;;  %v2748_v56 = vcombine.low %v1012_v42, %v1012_v42  ;;  %v2750_v57 = vcombine.low %v1220_v46, %v1220_v46 }
  0x25   : > { %2308 = vmatpush3.bf16.msra.mxu0 %v2428_v5  ;;  %2344 = vmatpush3.bf16.msra.mxu1 %v2428_v5  ;;  %377 = vst [vmem:[#allocation2 + $0x44] sm:$0x1] %v353_v32  ;;  %378 = vst [vmem:[#allocation2 + $0x48] sm:$0xff] %v354_v33   ;;  %v357_v38 = vld [vmem:[%s2691_s16 + $0x54] sm:$0xff]   ;;  %v359_v43 = vld [vmem:[%s2691_s16 + $0x5c] sm:$0x1] }
  0x26   : > { %380 = vst [vmem:[#allocation2 + $0x50] sm:$0x1] %v356_v34  ;;  %2309 = vmatprep.subr.bf16.mxu0 %v2686_v10  ;;  %2337 = vmatprep.subr.bf16.mxu1 %v2686_v10  ;;  %369 = vst [vmem:[#allocation2 + $0x24] sm:$0xff] %v345_v36   ;;  %s2083_s26 = sshll.u32 %s328_s29, 2  ;;  %v2432_v11 = vld [vmem:[%s3364_s3] sm:$0xff]   ;;  %s295_s28 = sand.u32 1, %s2515_s19  }
  0x27   : > { %371 = vst [vmem:[#allocation2 + $0x2c] sm:$0x1] %v347_v37  ;;  %381 = vst [vmem:[#allocation2 + $0x54] sm:$0xff] %v357_v38   ;;  %s2734_s27 = scalar_lea.vmem %s3362_s1, %s2083_s26  ;;  %v403_v52 = vld [vmem:[#allocation2] sm:$0xf]  ;;  %s2078_s29 = sshll.u32 %s295_s28, 6 }
  0x28   : > { %383 = vst [vmem:[#allocation2 + $0x5c] sm:$0x1] %v359_v43  ;;  %v384_v50 = vld [vmem:[%s2734_s27] sm:$0xff]   ;;  %v386_v51 = vld [vmem:[%s2734_s27 + $0x8] sm:$0x1]  ;;  %v444_v60 = vmul.bf16 %v2724_v40, %v403_v52  ;;  %v503_v62 = vmul.bf16 %v2727_v44, %v403_v52  ;;  %v656_v2 = vmul.bf16 %v2729_v45, %v403_v52  ;;  %s3276_s14 = scalar_lea.vmem [#allocation4], %s2078_s29 }
  0x29   : > { %2310 = vmatpush3.bf16.msra.mxu0 %v2686_v10  ;;  %2345 = vmatpush3.bf16.msra.mxu1 %v2686_v10  ;;  %v404_v53 = vld [vmem:[#allocation2 + $0x4] sm:$0xf]  ;;  %v405_v54 = vld [vmem:[#allocation2 + $0x8] sm:$0x1]  ;;  %391 = vst [vmem:[#allocation2 + $0x60] sm:$0xff] %v384_v50   ;;  %s2145_s26 = sshll.u32 %s2527_s22, 5 }
  0x2a   : > { %393 = vst [vmem:[#allocation2 + $0x68] sm:$0x1] %v386_v51  ;;  %2311 = vmatprep.subr.bf16.mxu0 %v2430_v39  ;;  %2338 = vmatprep.subr.bf16.mxu1 %v2430_v39  ;;  %v2755_v59 = vld [vmem:[#allocation2 + $0x14] sm:$0x1]  ;;  %v445_v61 = vmul.bf16 %v2724_v40, %v404_v53  ;;  %v504_v63 = vmul.bf16 %v2727_v44, %v404_v53  ;;  %v460_v3 = vunpack.c.l.bf16 %v444_v60  ;;  %v527_v5 = vunpack.c.l.bf16 %v503_v62  ;;  %v2774_v16 = vld [vmem:[#allocation2 + $0xc] sm:$0xf]  ;;  %s1962_s17 = sadd.s32 %s2188_s13, %s2145_s26 }
  0x2b   : > { %v505_v0 = vmul.bf16 %v2727_v44, %v405_v54  ;;  %v508_v1 = vmul.bf16 %v2727_v44, %v2755_v59  ;;  %v657_v6 = vmul.bf16 %v2729_v45, %v404_v53  ;;  %v658_v10 = vmul.bf16 %v2729_v45, %v405_v54  ;;  %v2777_v21 = vld [vmem:[#allocation2 + $0x10] sm:$0xf]  ;;  %v2801_v60 = vld [vmem:[#allocation2 + $0x18] sm:$0xf]  ;;  %s2146_s8 = sshll.u32 %s1962_s17, 6  ;;  %s1965_s21 = sshll.u32 %s3276_s14, 4  ;;  %s3304_s21 = int_to_ptr.vmem [resolvable:$true] %s1965_s21 }
  0x2c   : > { %v461_v4 = vunpack.c.l.bf16 %v445_v61  ;;  %v528_v7 = vunpack.c.l.bf16 %v504_v63  ;;  %v576_v12 = vrot.slane %v527_v5, 1  ;;  %v661_v13 = vmul.bf16 %v2729_v45, %v2755_v59  ;;  %v2803_v61 = vld [vmem:[#allocation2 + $0x1c] sm:$0xf]  ;;  %s3302_s30 = scalar_lea.hbm %s3366_s5, %s2146_s8  ;;  %s3310_s10 = scalar_lea.sflag [#allocation5], %s295_s28 }
  0x2d   : > { %2312 = vmatpush3.bf16.msra.mxu0 %v2430_v39  ;;  %2346 = vmatpush3.bf16.msra.mxu1 %v2430_v39  ;;  %v529_v8 = vunpack.c.l.bf16 %v505_v0  ;;  %v2766_v9 = vunpack.c.l.bf16 %v508_v1  ;;  %v680_v14 = vunpack.c.l.bf16 %v656_v2  ;;  %v681_v15 = vunpack.c.l.bf16 %v657_v6  ;;  %s2447_s12 = scalar_lea.vmem %s3304_s21, 1024  ;;  %s2453_s16 = scalar_lea.vmem %s2452_s15, 2048 }
  0x2e   : > { %2313 = vmatprep.subr.bf16.mxu0 %v2431_v58  ;;  %2339 = vmatprep.subr.bf16.mxu1 %v2431_v58  ;;  %v577_v17 = vrot.slane %v528_v7, 1  ;;  %v682_v20 = vunpack.c.l.bf16 %v658_v10  ;;  %v2779_v22 = vunpack.c.l.bf16 %v661_v13  ;;  %v809_v25 = vmul.bf16 %v2746_v55, %v2774_v16  ;;  %p2448_p1 = scmp.ne.s32.totalorder %s3304_s21, %s2447_s12  ;;  %p2454_p5 = scmp.lt.s32.totalorder %s3304_s21, %s2452_s15 }
  0x2f   : > { %v579_v18 = vrot.slane %v529_v8, 1  ;;  %v584_v19 = vrot.slane %v2766_v9, 1  ;;  %v729_v23 = vrot.slane %v680_v14, 2  ;;  %v730_v24 = vrot.slane %v681_v15, 2  ;;  %v2813_v14 = vld [vmem:[#allocation2 + $0x20] sm:$0x1]  ;;  %p2455_p6 = scmp.lt.s32.totalorder %s2453_s16, %s2447_s12 }
  0x30   : > { %v578_v26 = vsel %vm575_vm0, %v576_v12, %v577_v17  ;;  %v732_v28 = vrot.slane %v682_v20, 2  ;;  %v810_v29 = vmul.bf16 %v2746_v55, %v2777_v21  ;;  %v825_v33 = vunpack.c.l.bf16 %v809_v25  ;;  %p2449_p2 = pnand %p2448_p1, %p2625_p3 }
  0x31   : > { %2314 = vmatpush3.bf16.msra.mxu0 %v2431_v58  ;;  %2347 = vmatpush3.bf16.msra.mxu1 %v2431_v58  ;;  %v580_v27 = vsel %vm575_vm0, %v577_v17, %v579_v18  ;;  %v632_v30 = vadd.f32 %v578_v26, %v460_v3  ;;  %v731_v32 = vsel %vm728_vm1, %v729_v23, %v730_v24  ;;  %p2456_p7 = por %p2455_p6, %p2454_p5 }
  0x32   : > { %2315 = vmatprep.subr.bf16.mxu0 %v2432_v11  ;;  %2340 = vmatprep.subr.bf16.mxu1 %v2432_v11  ;;  %v633_v31 = vadd.f32 %v580_v27, %v461_v4  ;;  %v733_v34 = vsel %vm728_vm1, %v730_v24, %v732_v28  ;;  %v826_v35 = vunpack.c.l.bf16 %v810_v29  ;;  %v865_v36 = vmul.bf16 %v2736_v47, %v2774_v16  ;;  %p2450_p4 = pneg %p2449_p2 }
  0x33   : > { %v866_v37 = vmul.bf16 %v2736_v47, %v2777_v21  ;;  %v785_v38 = vadd.f32 %v731_v32, %v632_v30  ;;  %v867_v41 = vmul.bf16 %v2736_v47, %v2755_v59  ;;  %v1017_v42 = vmul.bf16 %v2748_v56, %v2774_v16 }
  0x34   : > { %v786_v39 = vadd.f32 %v733_v34, %v633_v31  ;;  %v889_v43 = vunpack.c.l.bf16 %v865_v36  ;;  %v1018_v50 = vmul.bf16 %v2748_v56, %v2777_v21  ;;  %v1019_v51 = vmul.bf16 %v2748_v56, %v2755_v59  ;;  %p2457_p9 = pnand %p2456_p7, %p2450_p4 }
  0x35   : > { %2316 = vmatpush3.bf16.msra.mxu0 %v2432_v11  ;;  %2348 = vmatpush3.bf16.msra.mxu1 %v2432_v11  ;;  %v890_v46 = vunpack.c.l.bf16 %v866_v37  ;;  %v841_v52 = vadd.f32 %v825_v33, %v785_v38  ;;  %v891_v54 = vunpack.c.l.bf16 %v867_v41  ;;  %v1041_v58 = vunpack.c.l.bf16 %v1017_v42  ;;  %v2829_v41 = vld [vmem:[#allocation2 + $0x34] sm:$0xf] }
  0x36   : > { %v842_v53 = vadd.f32 %v826_v35, %v786_v39  ;;  %v937_v62 = vrot.slane %v889_v43, 1  ;;  %v1042_v0 = vunpack.c.l.bf16 %v1018_v50  ;;  %v1043_v1 = vunpack.c.l.bf16 %v1019_v51  ;;  %v2827_v35 = vld [vmem:[#allocation2 + $0x30] sm:$0xf] }
  0x37   : > { %v938_v63 = vrot.slane %v890_v46, 1  ;;  %v940_v2 = vrot.slane %v891_v54, 1  ;;  %v1089_v3 = vrot.slane %v1041_v58, 2  ;;  %v1169_v4 = vmul.bf16 %v2738_v48, %v2801_v60  ;;  %v387_v51 = vld [vmem:[%s2734_s27 + $0xc] sm:$0xff]  }
  0x38   : > { %v1170_v59 = vmul.bf16 %v2738_v48, %v2803_v61  ;;  %v1090_v6 = vrot.slane %v1042_v0, 2  ;;  %v1092_v7 = vrot.slane %v1043_v1, 2  ;;  %v1225_v8 = vmul.bf16 %v2750_v57, %v2801_v60  ;;  %394 = vst [vmem:[#allocation2 + $0x6c] sm:$0xff] %v387_v51  }
  0x39   : > { %v939_v5 = vsel %vm575_vm0, %v937_v62, %v938_v63  ;;  %v941_v10 = vsel %vm575_vm0, %v938_v63, %v940_v2  ;;  %v1185_v12 = vunpack.c.l.bf16 %v1169_v4  ;;  %v1226_v20 = vmul.bf16 %v2750_v57, %v2803_v61  ;;  %v2838_v62 = vld [vmem:[#allocation2 + $0x38] sm:$0x1] }
  0x3a   : > { %v993_v11 = vadd.f32 %v939_v5, %v841_v52  ;;  %v1186_v13 = vunpack.c.l.bf16 %v1170_v59  ;;  %v994_v15 = vadd.f32 %v941_v10, %v842_v53  ;;  %v1091_v17 = vsel %vm728_vm1, %v1089_v3, %v1090_v6  ;;  %v389_v52 = vld [vmem:[%s2734_s27 + $0x14] sm:$0x1] }
  0x3b   : > { %v1093_v18 = vsel %vm728_vm1, %v1090_v6, %v1092_v7  ;;  %v1227_v24 = vmul.bf16 %v2750_v57, %v2813_v14  ;;  %v1249_v25 = vunpack.c.l.bf16 %v1225_v8  ;;  %v1377_v26 = vmul.bf16 %v2740_v49, %v2801_v60  ;;  %396 = vst [vmem:[#allocation2 + $0x74] sm:$0x1] %v389_v52 }
  0x3c   : > { %v1145_v23 = vadd.f32 %v1091_v17, %v993_v11  ;;  %v1146_v27 = vadd.f32 %v1093_v18, %v994_v15  ;;  %v1250_v28 = vunpack.c.l.bf16 %v1226_v20  ;;  %v1378_v29 = vmul.bf16 %v2740_v49, %v2803_v61 }
  0x3d   : > { %v1379_v30 = vmul.bf16 %v2740_v49, %v2813_v14  ;;  %v1251_v32 = vunpack.c.l.bf16 %v1227_v24  ;;  %v1297_v33 = vrot.slane %v1249_v25, 1  ;;  %v1401_v34 = vunpack.c.l.bf16 %v1377_v26 }
  0x3e   : > { %v1201_v31 = vadd.f32 %v1185_v12, %v1145_v23  ;;  %v1202_v36 = vadd.f32 %v1186_v13, %v1146_v27  ;;  %v1298_v37 = vrot.slane %v1250_v28, 1  ;;  %v1402_v38 = vunpack.c.l.bf16 %v1378_v29  ;;  %v2851_v13 = vld [vmem:[#allocation2 + $0x3c] sm:$0xf]  ;;  %v2859_v27 = vld [vmem:[#allocation2 + $0x40] sm:$0xf] }
  0x3f   : > { %v1403_v39 = vunpack.c.l.bf16 %v1379_v30  ;;  %v1300_v42 = vrot.slane %v1251_v32, 1  ;;  %v1449_v43 = vrot.slane %v1401_v34, 2  ;;  %v452_v46 = vmul.bf16 %v2724_v40, %v2827_v35 }
  0x40   : > { %v453_v50 = vmul.bf16 %v2724_v40, %v2829_v41  ;;  %v1299_v53 = vsel %vm575_vm0, %v1297_v33, %v1298_v37  ;;  %v1450_v54 = vrot.slane %v1402_v38, 2  ;;  %v515_v63 = vmul.bf16 %v2727_v44, %v2827_v35 }
  0x41   : > { %v1452_v58 = vrot.slane %v1403_v39, 2  ;;  %v1301_v0 = vsel %vm575_vm0, %v1298_v37, %v1300_v42  ;;  %v1353_v1 = vadd.f32 %v1299_v53, %v1201_v31  ;;  %v468_v2 = vunpack.c.l.bf16 %v452_v46  ;;  %v2866_v42 = vld [vmem:[#allocation2 + $0x44] sm:$0x1] }
  0x42   : > { %v469_v3 = vunpack.c.l.bf16 %v453_v50  ;;  %v1354_v4 = vadd.f32 %v1301_v0, %v1202_v36  ;;  %v1451_v59 = vsel %vm728_vm1, %v1449_v43, %v1450_v54  ;;  %v516_v6 = vmul.bf16 %v2727_v44, %v2829_v41 }
  0x43   : > { %v1453_v5 = vsel %vm728_vm1, %v1450_v54, %v1452_v58  ;;  %v1505_v7 = vadd.f32 %v1451_v59, %v1353_v1  ;;  %v517_v8 = vmul.bf16 %v2727_v44, %v2838_v62  ;;  %v539_v10 = vunpack.c.l.bf16 %v515_v63 }
  0x44   : > { %v668_v11 = vmul.bf16 %v2729_v45, %v2827_v35  ;;  %v1506_v12 = vadd.f32 %v1453_v5, %v1354_v4  ;;  %v540_v15 = vunpack.c.l.bf16 %v516_v6  ;;  %v669_v17 = vmul.bf16 %v2729_v45, %v2829_v41 }
  0x45   : > { %v670_v18 = vmul.bf16 %v2729_v45, %v2838_v62  ;;  %v541_v20 = vunpack.c.l.bf16 %v517_v8  ;;  %v596_v23 = vrot.slane %v539_v10, 1  ;;  %v817_v25 = vmul.bf16 %v2746_v55, %v2851_v13 }
  0x46   : > { %v692_v24 = vunpack.c.l.bf16 %v668_v11  ;;  %v2192_v26 = vpack.c.bf16 %v1506_v12, %v1505_v7  ;;  %v597_v28 = vrot.slane %v540_v15, 1  ;;  %v693_v29 = vunpack.c.l.bf16 %v669_v17  ;;  %v2881_v11 = vld [vmem:[#allocation2 + $0x48] sm:$0xf]  ;;  %v2883_v12 = vld [vmem:[#allocation2 + $0x4c] sm:$0xf] }
  0x47   : > { %v694_v30 = vunpack.c.l.bf16 %v670_v18  ;;  %v599_v31 = vrot.slane %v541_v20, 1  ;;  %v818_v33 = vmul.bf16 %v2746_v55, %v2859_v27  ;;  %v833_v34 = vunpack.c.l.bf16 %v817_v25 }
  0x48   : > { %v749_v32 = vrot.slane %v692_v24, 2  ;;  %2193 = vst [vmem:[#allocation3] sm:$0xff] %v2192_v26   ;;  %v598_v36 = vsel %vm575_vm0, %v596_v23, %v597_v28  ;;  %v750_v37 = vrot.slane %v693_v29, 2  ;;  %v877_v39 = vmul.bf16 %v2736_v47, %v2851_v13 }
  0x49   : > { %v752_v38 = vrot.slane %v694_v30, 2  ;;  %v600_v43 = vsel %vm575_vm0, %v597_v28, %v599_v31  ;;  %v640_v46 = vadd.f32 %v598_v36, %v468_v2  ;;  %v834_v50 = vunpack.c.l.bf16 %v818_v33  ;;  %v2891_v33 = vld [vmem:[#allocation2 + $0x50] sm:$0x1] }
  0x4a   : > { %v878_v51 = vmul.bf16 %v2736_v47, %v2859_v27  ;;  %v641_v52 = vadd.f32 %v600_v43, %v469_v3  ;;  %v751_v53 = vsel %vm728_vm1, %v749_v32, %v750_v37  ;;  %v879_v58 = vmul.bf16 %v2736_v47, %v2866_v42 }
  0x4b   : > { %v753_v54 = vsel %vm728_vm1, %v750_v37, %v752_v38  ;;  %v793_v63 = vadd.f32 %v751_v53, %v640_v46  ;;  %v901_v0 = vunpack.c.l.bf16 %v877_v39  ;;  %v1029_v4 = vmul.bf16 %v2748_v56, %v2851_v13 }
  0x4c   : > { %v902_v1 = vunpack.c.l.bf16 %v878_v51  ;;  %v794_v59 = vadd.f32 %v753_v54, %v641_v52  ;;  %v903_v2 = vunpack.c.l.bf16 %v879_v58  ;;  %v1030_v5 = vmul.bf16 %v2748_v56, %v2859_v27 }
  0x4d   : > { %v1031_v3 = vmul.bf16 %v2748_v56, %v2866_v42  ;;  %v849_v6 = vadd.f32 %v833_v34, %v793_v63  ;;  %v957_v7 = vrot.slane %v901_v0, 1  ;;  %v1053_v10 = vunpack.c.l.bf16 %v1029_v4 }
  0x4e   : > { %v958_v8 = vrot.slane %v902_v1, 1  ;;  %v850_v15 = vadd.f32 %v834_v50, %v794_v59  ;;  %v960_v17 = vrot.slane %v903_v2, 1  ;;  %v1054_v18 = vunpack.c.l.bf16 %v1030_v5 }
  0x4f   : > { %v1055_v20 = vunpack.c.l.bf16 %v1031_v3  ;;  %v2433_v23 = vld [vmem:[#allocation3] sm:$0xff]   ;;  %v1109_v25 = vrot.slane %v1053_v10, 2  ;;  %v1177_v26 = vmul.bf16 %v2738_v48, %v2881_v11  ;;  %v1178_v28 = vmul.bf16 %v2738_v48, %v2883_v12 }
  0x50   : > { %v959_v24 = vsel %vm575_vm0, %v957_v7, %v958_v8  ;;  %v961_v29 = vsel %vm575_vm0, %v958_v8, %v960_v17  ;;  %v1110_v31 = vrot.slane %v1054_v18, 2  ;;  %2317 = vmatprep.mubr.bf16.mxu0 %v2433_v23  ;;  %v1237_v38 = vmul.bf16 %v2750_v57, %v2881_v11 }
  0x51   : > { %v1001_v30 = vadd.f32 %v959_v24, %v849_v6  ;;  %v1112_v32 = vrot.slane %v1055_v20, 2  ;;  %v1002_v34 = vadd.f32 %v961_v29, %v850_v15  ;;  %v1193_v36 = vunpack.c.l.bf16 %v1177_v26 }
  0x52   : > { %v1194_v37 = vunpack.c.l.bf16 %v1178_v28  ;;  %v1111_v39 = vsel %vm728_vm1, %v1109_v25, %v1110_v31  ;;  %v1238_v46 = vmul.bf16 %v2750_v57, %v2883_v12  ;;  %v1239_v50 = vmul.bf16 %v2750_v57, %v2891_v33 }
  0x53   : > { %v1113_v43 = vsel %vm728_vm1, %v1110_v31, %v1112_v32  ;;  %v1153_v51 = vadd.f32 %v1111_v39, %v1001_v30  ;;  %v1261_v53 = vunpack.c.l.bf16 %v1237_v38  ;;  %v1389_v54 = vmul.bf16 %v2740_v49, %v2881_v11 }
  0x54   : > { %v1154_v52 = vadd.f32 %v1113_v43, %v1002_v34  ;;  %v1262_v58 = vunpack.c.l.bf16 %v1238_v46  ;;  %v1263_v63 = vunpack.c.l.bf16 %v1239_v50  ;;  %v1390_v0 = vmul.bf16 %v2740_v49, %v2883_v12 }
  0x55   : > { %v1391_v1 = vmul.bf16 %v2740_v49, %v2891_v33  ;;  %v1209_v4 = vadd.f32 %v1193_v36, %v1153_v51  ;;  %v1317_v2 = vrot.slane %v1261_v53, 1  ;;  %v1413_v5 = vunpack.c.l.bf16 %v1389_v54 }
  0x56   : > { %v1210_v59 = vadd.f32 %v1194_v37, %v1154_v52  ;;  %v1318_v3 = vrot.slane %v1262_v58, 1  ;;  %v1320_v6 = vrot.slane %v1263_v63, 1  ;;  %v1414_v7 = vunpack.c.l.bf16 %v1390_v0 }
  0x57   : > { %v1415_v8 = vunpack.c.l.bf16 %v1391_v1  ;;  %v1469_v10 = vrot.slane %v1413_v5, 2  ;;  %v446_v15 = vmul.bf16 %v2724_v40, %v2774_v16  ;;  %v447_v17 = vmul.bf16 %v2724_v40, %v2777_v21 }
  0x58   : > { %v506_v18 = vmul.bf16 %v2727_v44, %v2774_v16  ;;  %v1319_v20 = vsel %vm575_vm0, %v1317_v2, %v1318_v3  ;;  %v1321_v23 = vsel %vm575_vm0, %v1318_v3, %v1320_v6  ;;  %v1470_v24 = vrot.slane %v1414_v7, 2 }
  0x59   : > { %v1472_v25 = vrot.slane %v1415_v8, 2  ;;  %v1361_v26 = vadd.f32 %v1319_v20, %v1209_v4  ;;  %v1362_v28 = vadd.f32 %v1321_v23, %v1210_v59  ;;  %v462_v29 = vunpack.c.l.bf16 %v446_v15 }
  0x5a   : > { %v463_v30 = vunpack.c.l.bf16 %v447_v17  ;;  %v1471_v31 = vsel %vm728_vm1, %v1469_v10, %v1470_v24  ;;  %v507_v34 = vmul.bf16 %v2727_v44, %v2777_v21  ;;  %v530_v36 = vunpack.c.l.bf16 %v506_v18 }
  0x5b   : > { %v1473_v32 = vsel %vm728_vm1, %v1470_v24, %v1472_v25  ;;  %v1513_v37 = vadd.f32 %v1471_v31, %v1361_v26  ;;  %v659_v39 = vmul.bf16 %v2729_v45, %v2774_v16  ;;  %v660_v43 = vmul.bf16 %v2729_v45, %v2777_v21  ;;  %v2942_v25 = vld [vmem:[#allocation2 + $0x24] sm:$0xf] }
  0x5c   : > { %v1514_v38 = vadd.f32 %v1473_v32, %v1362_v28  ;;  %v531_v46 = vunpack.c.l.bf16 %v507_v34  ;;  %v581_v50 = vrot.slane %v530_v36, 1  ;;  %v737_v51 = vrot.slane %v2779_v22, 2  ;;  %v2951_v34 = vld [vmem:[#allocation2 + $0x28] sm:$0xf] }
  0x5d   : > { %v811_v52 = vmul.bf16 %v2746_v55, %v2801_v60  ;;  %v683_v54 = vunpack.c.l.bf16 %v659_v39  ;;  %v684_v58 = vunpack.c.l.bf16 %v660_v43  ;;  %v812_v63 = vmul.bf16 %v2746_v55, %v2803_v61 }
  0x5e   : > { %v2212_v53 = vpack.c.bf16 %v1514_v38, %v1513_v37  ;;  %v582_v0 = vrot.slane %v531_v46, 1  ;;  %v868_v16 = vmul.bf16 %v2736_v47, %v2801_v60  ;;  %v869_v21 = vmul.bf16 %v2736_v47, %v2803_v61 }
  0x5f   : > { %v827_v1 = vunpack.c.l.bf16 %v811_v52  ;;  %v734_v4 = vrot.slane %v683_v54, 2  ;;  %v735_v22 = vrot.slane %v684_v58, 2  ;;  %v828_v59 = vunpack.c.l.bf16 %v812_v63 }
  0x60   : > { %2274 = vst [vmem:[#allocation3 + $0x20] sm:$0xff] %v2212_v53   ;;  %v870_v2 = vmul.bf16 %v2736_v47, %v2813_v14  ;;  %v583_v5 = vsel %vm575_vm0, %v581_v50, %v582_v0  ;;  %v585_v3 = vsel %vm575_vm0, %v582_v0, %v584_v19  ;;  %v892_v6 = vunpack.c.l.bf16 %v868_v16  ;;  %v2956_v53 = vld [vmem:[#allocation2 + $0x2c] sm:$0x1] }
  0x61   : > { %v893_v7 = vunpack.c.l.bf16 %v869_v21  ;;  %v634_v8 = vadd.f32 %v583_v5, %v462_v29  ;;  %v635_v10 = vadd.f32 %v585_v3, %v463_v30  ;;  %v736_v15 = vsel %vm728_vm1, %v734_v4, %v735_v22 }
  0x62   : > { %v738_v17 = vsel %vm728_vm1, %v735_v22, %v737_v51  ;;  %v894_v18 = vunpack.c.l.bf16 %v870_v2  ;;  %v942_v20 = vrot.slane %v892_v6, 1  ;;  %v1020_v24 = vmul.bf16 %v2748_v56, %v2801_v60 }
  0x63   : > { %v943_v23 = vrot.slane %v893_v7, 1  ;;  %v787_v26 = vadd.f32 %v736_v15, %v634_v8  ;;  %v788_v9 = vadd.f32 %v738_v17, %v635_v10  ;;  %v1021_v19 = vmul.bf16 %v2748_v56, %v2803_v61 }
  0x64   : > { %v1022_v28 = vmul.bf16 %v2748_v56, %v2813_v14  ;;  %v945_v30 = vrot.slane %v894_v18, 1  ;;  %v1044_v31 = vunpack.c.l.bf16 %v1020_v24  ;;  %v1171_v32 = vmul.bf16 %v2738_v48, %v2942_v25 }
  0x65   : > { %v944_v29 = vsel %vm575_vm0, %v942_v20, %v943_v23  ;;  %v843_v36 = vadd.f32 %v827_v1, %v787_v26  ;;  %v844_v37 = vadd.f32 %v828_v59, %v788_v9  ;;  %v1045_v38 = vunpack.c.l.bf16 %v1021_v19 }
  0x66   : > { %v1046_v39 = vunpack.c.l.bf16 %v1022_v28  ;;  %v946_v46 = vsel %vm575_vm0, %v943_v23, %v945_v30  ;;  %v1094_v50 = vrot.slane %v1044_v31, 2  ;;  %v1172_v51 = vmul.bf16 %v2738_v48, %v2951_v34 }
  0x67   : > { %v2434_v43 = vld [vmem:[#allocation3 + $0x20] sm:$0xff]   ;;  %v1187_v52 = vunpack.c.l.bf16 %v1171_v32  ;;  %v995_v54 = vadd.f32 %v944_v29, %v843_v36  ;;  %v996_v58 = vadd.f32 %v946_v46, %v844_v37  ;;  %v1095_v63 = vrot.slane %v1045_v38, 2 }
  0x68   : > { %v1097_v0 = vrot.slane %v1046_v39, 2  ;;  %2325 = vmatprep.mubr.bf16.mxu1 %v2434_v43  ;;  %v1188_v16 = vunpack.c.l.bf16 %v1172_v51  ;;  %v1228_v1 = vmul.bf16 %v2750_v57, %v2942_v25  ;;  %v1229_v21 = vmul.bf16 %v2750_v57, %v2951_v34 }
  0x69   : > { %v1230_v4 = vmul.bf16 %v2750_v57, %v2956_v53  ;;  %v1096_v22 = vsel %vm728_vm1, %v1094_v50, %v1095_v63  ;;  %v1380_v2 = vmul.bf16 %v2740_v49, %v2942_v25  ;;  %v1381_v5 = vmul.bf16 %v2740_v49, %v2951_v34 }
  0x6a   : > { %v1098_v59 = vsel %vm728_vm1, %v1095_v63, %v1097_v0  ;;  %v1147_v3 = vadd.f32 %v1096_v22, %v995_v54  ;;  %v1252_v7 = vunpack.c.l.bf16 %v1228_v1  ;;  %v1253_v8 = vunpack.c.l.bf16 %v1229_v21 }
  0x6b   : > { %v1148_v6 = vadd.f32 %v1098_v59, %v996_v58  ;;  %v1254_v10 = vunpack.c.l.bf16 %v1230_v4  ;;  %v1382_v15 = vmul.bf16 %v2740_v49, %v2956_v53  ;;  %v1404_v17 = vunpack.c.l.bf16 %v1380_v2 }
  0x6c   : > { %v1405_v18 = vunpack.c.l.bf16 %v1381_v5  ;;  %v1203_v20 = vadd.f32 %v1187_v52, %v1147_v3  ;;  %v1302_v24 = vrot.slane %v1252_v7, 1  ;;  %v1303_v26 = vrot.slane %v1253_v8, 1 }
  0x6d   : > { %v1204_v23 = vadd.f32 %v1188_v16, %v1148_v6  ;;  %v1305_v9 = vrot.slane %v1254_v10, 1  ;;  %v1406_v19 = vunpack.c.l.bf16 %v1382_v15  ;;  %v1454_v28 = vrot.slane %v1404_v17, 2 }
  0x6e   : > { %v1455_v29 = vrot.slane %v1405_v18, 2  ;;  %v1304_v30 = vsel %vm575_vm0, %v1302_v24, %v1303_v26  ;;  %v454_v31 = vmul.bf16 %v2724_v40, %v2851_v13  ;;  %v455_v32 = vmul.bf16 %v2724_v40, %v2859_v27 }
  0x6f   : > { %v518_v36 = vmul.bf16 %v2727_v44, %v2851_v13  ;;  %v1306_v37 = vsel %vm575_vm0, %v1303_v26, %v1305_v9  ;;  %v1355_v38 = vadd.f32 %v1304_v30, %v1203_v20  ;;  %v1457_v43 = vrot.slane %v1406_v19, 2 }
  0x70   : > { %v1456_v39 = vsel %vm728_vm1, %v1454_v28, %v1455_v29  ;;  %v1356_v46 = vadd.f32 %v1306_v37, %v1204_v23  ;;  %v470_v50 = vunpack.c.l.bf16 %v454_v31  ;;  %v471_v51 = vunpack.c.l.bf16 %v455_v32 }
  0x71   : > { %v519_v52 = vmul.bf16 %v2727_v44, %v2859_v27  ;;  %v1458_v54 = vsel %vm728_vm1, %v1455_v29, %v1457_v43  ;;  %v1507_v58 = vadd.f32 %v1456_v39, %v1355_v38  ;;  %v520_v63 = vmul.bf16 %v2727_v44, %v2866_v42 }
  0x72   : > { %v542_v0 = vunpack.c.l.bf16 %v518_v36  ;;  %v1508_v16 = vadd.f32 %v1458_v54, %v1356_v46  ;;  %v671_v21 = vmul.bf16 %v2729_v45, %v2851_v13  ;;  %v672_v4 = vmul.bf16 %v2729_v45, %v2859_v27 }
  0x73   : > { %v543_v1 = vunpack.c.l.bf16 %v519_v52  ;;  %v544_v22 = vunpack.c.l.bf16 %v520_v63  ;;  %v673_v2 = vmul.bf16 %v2729_v45, %v2866_v42  ;;  %v819_v5 = vmul.bf16 %v2746_v55, %v2881_v11  ;;  %v3014_v63 = vld [vmem:[#allocation2 + $0x58] sm:$0xf] }
  0x74   : > { %v601_v59 = vrot.slane %v542_v0, 1  ;;  %v2197_v3 = vpack.c.bf16 %v1508_v16, %v1507_v58  ;;  %v695_v7 = vunpack.c.l.bf16 %v671_v21  ;;  %v696_v8 = vunpack.c.l.bf16 %v672_v4  ;;  %v3012_v58 = vld [vmem:[#allocation2 + $0x54] sm:$0xf] }
  0x75   : > { %v602_v6 = vrot.slane %v543_v1, 1  ;;  %v604_v10 = vrot.slane %v544_v22, 1  ;;  %v697_v15 = vunpack.c.l.bf16 %v673_v2  ;;  %v820_v13 = vmul.bf16 %v2746_v55, %v2883_v12 }
  0x76   : > { %v835_v17 = vunpack.c.l.bf16 %v819_v5  ;;  %2271 = vst [vmem:[#allocation3 + $0x8] sm:$0xff] %v2197_v3   ;;  %v754_v18 = vrot.slane %v695_v7, 2  ;;  %v755_v20 = vrot.slane %v696_v8, 2  ;;  %v880_v42 = vmul.bf16 %v2736_v47, %v2881_v11 }
  0x77   : > { %v603_v27 = vsel %vm575_vm0, %v601_v59, %v602_v6  ;;  %v605_v23 = vsel %vm575_vm0, %v602_v6, %v604_v10  ;;  %v757_v26 = vrot.slane %v697_v15, 2  ;;  %v836_v9 = vunpack.c.l.bf16 %v820_v13  ;;  %v3024_v10 = vld [vmem:[#allocation2 + $0x5c] sm:$0x1] }
  0x78   : > { %v642_v24 = vadd.f32 %v603_v27, %v470_v50  ;;  %v643_v19 = vadd.f32 %v605_v23, %v471_v51  ;;  %v756_v28 = vsel %vm728_vm1, %v754_v18, %v755_v20  ;;  %v881_v29 = vmul.bf16 %v2736_v47, %v2883_v12 }
  0x79   : > { %v882_v30 = vmul.bf16 %v2736_v47, %v2891_v33  ;;  %v758_v31 = vsel %vm728_vm1, %v755_v20, %v757_v26  ;;  %v904_v36 = vunpack.c.l.bf16 %v880_v42  ;;  %v1032_v37 = vmul.bf16 %v2748_v56, %v2881_v11 }
  0x7a   : > { %v795_v32 = vadd.f32 %v756_v28, %v642_v24  ;;  %v796_v38 = vadd.f32 %v758_v31, %v643_v19  ;;  %v905_v39 = vunpack.c.l.bf16 %v881_v29  ;;  %v1033_v46 = vmul.bf16 %v2748_v56, %v2883_v12 }
  0x7b   : > { %v906_v43 = vunpack.c.l.bf16 %v882_v30  ;;  %v962_v51 = vrot.slane %v904_v36, 1  ;;  %v1034_v52 = vmul.bf16 %v2748_v56, %v2891_v33  ;;  %v1056_v54 = vunpack.c.l.bf16 %v1032_v37 }
  0x7c   : > { %v851_v50 = vadd.f32 %v835_v17, %v795_v32  ;;  %v852_v0 = vadd.f32 %v836_v9, %v796_v38  ;;  %v963_v16 = vrot.slane %v905_v39, 1  ;;  %v1057_v21 = vunpack.c.l.bf16 %v1033_v46 }
  0x7d   : > { %v965_v1 = vrot.slane %v906_v43, 1  ;;  %v2435_v4 = vld [vmem:[#allocation3 + $0x8] sm:$0xff]   ;;  %v1058_v22 = vunpack.c.l.bf16 %v1034_v52  ;;  %v1114_v59 = vrot.slane %v1056_v54, 2  ;;  %v1179_v2 = vmul.bf16 %v2738_v48, %v3012_v58 }
  0x7e   : > { %v1180_v5 = vmul.bf16 %v2738_v48, %v3014_v63  ;;  %v964_v3 = vsel %vm575_vm0, %v962_v51, %v963_v16  ;;  %v1115_v7 = vrot.slane %v1057_v21, 2  ;;  %v1240_v8 = vmul.bf16 %v2750_v57, %v3012_v58  ;;  %2318 = vmatmul.mubr.bf16.vlgmr.msra.gmra.mxu0 %v2435_v4 }
  0x7f   : > { %v966_v6 = vsel %vm575_vm0, %v963_v16, %v965_v1  ;;  %v1003_v15 = vadd.f32 %v964_v3, %v851_v50  ;;  %v1117_v17 = vrot.slane %v1058_v22, 2  ;;  %v1195_v27 = vunpack.c.l.bf16 %v1179_v2 }
  0x80   : > { %v1004_v13 = vadd.f32 %v966_v6, %v852_v0  ;;  %v1116_v18 = vsel %vm728_vm1, %v1114_v59, %v1115_v7  ;;  %v1196_v20 = vunpack.c.l.bf16 %v1180_v5  ;;  %v1241_v42 = vmul.bf16 %v2750_v57, %v3014_v63 }
  0x81   : > { %v1242_v23 = vmul.bf16 %v2750_v57, %v3024_v10  ;;  %v1118_v24 = vsel %vm728_vm1, %v1115_v7, %v1117_v17  ;;  %v1155_v26 = vadd.f32 %v1116_v18, %v1003_v15  ;;  %v1264_v9 = vunpack.c.l.bf16 %v1240_v8 }
  0x82   : > { %v1392_v19 = vmul.bf16 %v2740_v49, %v3012_v58  ;;  %v1156_v28 = vadd.f32 %v1118_v24, %v1004_v13  ;;  %v1265_v29 = vunpack.c.l.bf16 %v1241_v42  ;;  %v1393_v31 = vmul.bf16 %v2740_v49, %v3014_v63 }
  0x83   : > { %v1266_v30 = vunpack.c.l.bf16 %v1242_v23  ;;  %v1211_v32 = vadd.f32 %v1195_v27, %v1155_v26  ;;  %v1322_v36 = vrot.slane %v1264_v9, 1  ;;  %v1394_v37 = vmul.bf16 %v2740_v49, %v3024_v10 }
  0x84   : > { %v1416_v38 = vunpack.c.l.bf16 %v1392_v19  ;;  %v1212_v39 = vadd.f32 %v1196_v20, %v1156_v28  ;;  %v1323_v43 = vrot.slane %v1265_v29, 1  ;;  %v1417_v50 = vunpack.c.l.bf16 %v1393_v31 }
  0x85   : > { %v1325_v46 = vrot.slane %v1266_v30, 1  ;;  %v1418_v51 = vunpack.c.l.bf16 %v1394_v37  ;;  %v448_v54 = vmul.bf16 %v2724_v40, %v2801_v60  ;;  %v449_v0 = vmul.bf16 %v2724_v40, %v2803_v61 }
  0x86   : > { %v1474_v52 = vrot.slane %v1416_v38, 2  ;;  %v1324_v16 = vsel %vm575_vm0, %v1322_v36, %v1323_v43  ;;  %v1475_v21 = vrot.slane %v1417_v50, 2  ;;  %v509_v4 = vmul.bf16 %v2727_v44, %v2801_v60 }
  0x87   : > { %v1326_v1 = vsel %vm575_vm0, %v1323_v43, %v1325_v46  ;;  %v1363_v22 = vadd.f32 %v1324_v16, %v1211_v32  ;;  %v1477_v2 = vrot.slane %v1418_v51, 2  ;;  %v464_v5 = vunpack.c.l.bf16 %v448_v54 }
  0x88   : > { %v1364_v59 = vadd.f32 %v1326_v1, %v1212_v39  ;;  %v1476_v3 = vsel %vm728_vm1, %v1474_v52, %v1475_v21  ;;  %v465_v6 = vunpack.c.l.bf16 %v449_v0  ;;  %v510_v7 = vmul.bf16 %v2727_v44, %v2803_v61 }
  0x89   : > { %v511_v8 = vmul.bf16 %v2727_v44, %v2813_v14  ;;  %v1478_v15 = vsel %vm728_vm1, %v1475_v21, %v1477_v2  ;;  %v1515_v13 = vadd.f32 %v1476_v3, %v1363_v22  ;;  %v533_v17 = vunpack.c.l.bf16 %v509_v4 }
  0x8a   : > { %v662_v27 = vmul.bf16 %v2729_v45, %v2801_v60  ;;  %v1516_v18 = vadd.f32 %v1478_v15, %v1364_v59  ;;  %v534_v20 = vunpack.c.l.bf16 %v510_v7  ;;  %v663_v23 = vmul.bf16 %v2729_v45, %v2803_v61 }
  0x8b   : > { %v535_v42 = vunpack.c.l.bf16 %v511_v8  ;;  %v586_v24 = vrot.slane %v533_v17, 1  ;;  %v664_v26 = vmul.bf16 %v2729_v45, %v2813_v14  ;;  %v813_v19 = vmul.bf16 %v2746_v55, %v2942_v25 }
  0x8c   : > { %v686_v9 = vunpack.c.l.bf16 %v662_v27  ;;  %v2217_v28 = vpack.c.bf16 %v1516_v18, %v1515_v13  ;;  %v587_v29 = vrot.slane %v534_v20, 1  ;;  %v687_v31 = vunpack.c.l.bf16 %v663_v23 }
  0x8d   : > { %v589_v30 = vrot.slane %v535_v42, 1  ;;  %v688_v32 = vunpack.c.l.bf16 %v664_v26  ;;  %v814_v36 = vmul.bf16 %v2746_v55, %v2951_v34  ;;  %v829_v37 = vunpack.c.l.bf16 %v813_v19 }
  0x8e   : > { %v739_v60 = vrot.slane %v686_v9, 2  ;;  %2275 = vst [vmem:[#allocation3 + $0x28] sm:$0xff] %v2217_v28   ;;  %v588_v61 = vsel %vm575_vm0, %v586_v24, %v587_v29  ;;  %v740_v14 = vrot.slane %v687_v31, 2  ;;  %v871_v39 = vmul.bf16 %v2736_v47, %v2942_v25 }
  0x8f   : > { %v590_v38 = vsel %vm575_vm0, %v587_v29, %v589_v30  ;;  %v636_v43 = vadd.f32 %v588_v61, %v464_v5  ;;  %v742_v50 = vrot.slane %v688_v32, 2  ;;  %v830_v51 = vunpack.c.l.bf16 %v814_v36 }
  0x90   : > { %v637_v46 = vadd.f32 %v590_v38, %v465_v6  ;;  %v741_v52 = vsel %vm728_vm1, %v739_v60, %v740_v14  ;;  %v872_v54 = vmul.bf16 %v2736_v47, %v2951_v34  ;;  %v873_v0 = vmul.bf16 %v2736_v47, %v2956_v53 }
  0x91   : > { %v895_v16 = vunpack.c.l.bf16 %v871_v39  ;;  %v743_v1 = vsel %vm728_vm1, %v740_v14, %v742_v50  ;;  %v789_v21 = vadd.f32 %v741_v52, %v636_v43  ;;  %v1023_v4 = vmul.bf16 %v2748_v56, %v2942_v25 }
  0x92   : > { %v1024_v22 = vmul.bf16 %v2748_v56, %v2951_v34  ;;  %v790_v59 = vadd.f32 %v743_v1, %v637_v46  ;;  %v896_v2 = vunpack.c.l.bf16 %v872_v54  ;;  %v897_v5 = vunpack.c.l.bf16 %v873_v0 }
  0x93   : > { %v947_v3 = vrot.slane %v895_v16, 1  ;;  %v845_v6 = vadd.f32 %v829_v37, %v789_v21  ;;  %v1025_v7 = vmul.bf16 %v2748_v56, %v2956_v53  ;;  %v1047_v8 = vunpack.c.l.bf16 %v1023_v4 }
  0x94   : > { %v1048_v15 = vunpack.c.l.bf16 %v1024_v22  ;;  %v846_v13 = vadd.f32 %v830_v51, %v790_v59  ;;  %v948_v17 = vrot.slane %v896_v2, 1  ;;  %v950_v27 = vrot.slane %v897_v5, 1 }
  0x95   : > { %v1173_v18 = vmul.bf16 %v2738_v48, %v2827_v35  ;;  %v2436_v20 = vld [vmem:[#allocation3 + $0x28] sm:$0xff]   ;;  %v1049_v42 = vunpack.c.l.bf16 %v1025_v7  ;;  %v1099_v23 = vrot.slane %v1047_v8, 2  ;;  %v1174_v24 = vmul.bf16 %v2738_v48, %v2829_v41 }
  0x96   : > { %v1231_v26 = vmul.bf16 %v2750_v57, %v2827_v35  ;;  %v949_v9 = vsel %vm575_vm0, %v947_v3, %v948_v17  ;;  %v951_v19 = vsel %vm575_vm0, %v948_v17, %v950_v27  ;;  %v1100_v28 = vrot.slane %v1048_v15, 2  ;;  %2326 = vmatmul.mubr.bf16.vlgmr.msra.gmra.mxu1 %v2436_v20 }
  0x97   : > { %v1189_v29 = vunpack.c.l.bf16 %v1173_v18  ;;  %v997_v30 = vadd.f32 %v949_v9, %v845_v6  ;;  %v998_v31 = vadd.f32 %v951_v19, %v846_v13  ;;  %v1102_v32 = vrot.slane %v1049_v42, 2 }
  0x98   : > { %v1190_v60 = vunpack.c.l.bf16 %v1174_v24  ;;  %v1101_v36 = vsel %vm728_vm1, %v1099_v23, %v1100_v28  ;;  %v1232_v37 = vmul.bf16 %v2750_v57, %v2829_v41  ;;  %v1233_v61 = vmul.bf16 %v2750_v57, %v2838_v62 }
  0x99   : > { %v1255_v38 = vunpack.c.l.bf16 %v1231_v26  ;;  %v1103_v14 = vsel %vm728_vm1, %v1100_v28, %v1102_v32  ;;  %v1149_v39 = vadd.f32 %v1101_v36, %v997_v30  ;;  %v1383_v43 = vmul.bf16 %v2740_v49, %v2827_v35 }
  0x9a   : > { %v1384_v46 = vmul.bf16 %v2740_v49, %v2829_v41  ;;  %v1150_v50 = vadd.f32 %v1103_v14, %v998_v31  ;;  %v1256_v51 = vunpack.c.l.bf16 %v1232_v37  ;;  %v1257_v52 = vunpack.c.l.bf16 %v1233_v61 }
  0x9b   : > { %v1307_v54 = vrot.slane %v1255_v38, 1  ;;  %v1205_v0 = vadd.f32 %v1189_v29, %v1149_v39  ;;  %v1385_v16 = vmul.bf16 %v2740_v49, %v2838_v62  ;;  %v1407_v1 = vunpack.c.l.bf16 %v1383_v43 }
  0x9c   : > { %v1408_v21 = vunpack.c.l.bf16 %v1384_v46  ;;  %v1206_v4 = vadd.f32 %v1190_v60, %v1150_v50  ;;  %v1308_v22 = vrot.slane %v1256_v51, 1  ;;  %v1310_v59 = vrot.slane %v1257_v52, 1 }
  0x9d   : > { %v456_v2 = vmul.bf16 %v2724_v40, %v2881_v11  ;;  %v1409_v35 = vunpack.c.l.bf16 %v1385_v16  ;;  %v1459_v5 = vrot.slane %v1407_v1, 2  ;;  %v457_v41 = vmul.bf16 %v2724_v40, %v2883_v12 }
  0x9e   : > { %v1460_v3 = vrot.slane %v1408_v21, 2  ;;  %v1309_v6 = vsel %vm575_vm0, %v1307_v54, %v1308_v22  ;;  %v1311_v7 = vsel %vm575_vm0, %v1308_v22, %v1310_v59  ;;  %v521_v62 = vmul.bf16 %v2727_v44, %v2881_v11 }
  0x9f   : > { %v472_v8 = vunpack.c.l.bf16 %v456_v2  ;;  %v1357_v15 = vadd.f32 %v1309_v6, %v1205_v0  ;;  %v1358_v13 = vadd.f32 %v1311_v7, %v1206_v4  ;;  %v1462_v27 = vrot.slane %v1409_v35, 2 }
  0xa0   : > { %v1461_v17 = vsel %vm728_vm1, %v1459_v5, %v1460_v3  ;;  %v473_v18 = vunpack.c.l.bf16 %v457_v41  ;;  %v522_v20 = vmul.bf16 %v2727_v44, %v2883_v12  ;;  %v523_v42 = vmul.bf16 %v2727_v44, %v2891_v33 }
  0xa1   : > { %v545_v23 = vunpack.c.l.bf16 %v521_v62  ;;  %v1463_v24 = vsel %vm728_vm1, %v1460_v3, %v1462_v27  ;;  %v1509_v26 = vadd.f32 %v1461_v17, %v1357_v15  ;;  %v674_v9 = vmul.bf16 %v2729_v45, %v2881_v11  ;;  %v3138_v62 = vld [vmem:[#allocation2 + $0x60] sm:$0xf] }
  0xa2   : > { %v675_v19 = vmul.bf16 %v2729_v45, %v2883_v12  ;;  %v1510_v28 = vadd.f32 %v1463_v24, %v1358_v13  ;;  %v546_v29 = vunpack.c.l.bf16 %v522_v20  ;;  %v547_v30 = vunpack.c.l.bf16 %v523_v42 }
  0xa3   : > { %v606_v31 = vrot.slane %v545_v23, 1  ;;  %v676_v32 = vmul.bf16 %v2729_v45, %v2891_v33  ;;  %v698_v60 = vunpack.c.l.bf16 %v674_v9  ;;  %v821_v37 = vmul.bf16 %v2746_v55, %v3012_v58 }
  0xa4   : > { %v699_v36 = vunpack.c.l.bf16 %v675_v19  ;;  %v2202_v61 = vpack.c.bf16 %v1510_v28, %v1509_v26  ;;  %v607_v38 = vrot.slane %v546_v29, 1  ;;  %v609_v14 = vrot.slane %v547_v30, 1 }
  0xa5   : > { %v822_v11 = vmul.bf16 %v2746_v55, %v3014_v63  ;;  %v700_v39 = vunpack.c.l.bf16 %v676_v32  ;;  %v759_v12 = vrot.slane %v698_v60, 2  ;;  %v837_v46 = vunpack.c.l.bf16 %v821_v37 }
  0xa6   : > { %v760_v43 = vrot.slane %v699_v36, 2  ;;  %2272 = vst [vmem:[#allocation3 + $0x10] sm:$0xff] %v2202_v61   ;;  %v608_v50 = vsel %vm575_vm0, %v606_v31, %v607_v38  ;;  %v610_v33 = vsel %vm575_vm0, %v607_v38, %v609_v14  ;;  %v883_v52 = vmul.bf16 %v2736_v47, %v3012_v58  ;;  %v3152_v36 = vld [vmem:[#allocation2 + $0x68] sm:$0x1] }
  0xa7   : > { %v838_v51 = vunpack.c.l.bf16 %v822_v11  ;;  %v644_v54 = vadd.f32 %v608_v50, %v472_v8  ;;  %v645_v0 = vadd.f32 %v610_v33, %v473_v18  ;;  %v762_v1 = vrot.slane %v700_v39, 2  ;;  %v3140_v18 = vld [vmem:[#allocation2 + $0x64] sm:$0xf] }
  0xa8   : > { %v761_v16 = vsel %vm728_vm1, %v759_v12, %v760_v43  ;;  %v884_v21 = vmul.bf16 %v2736_v47, %v3014_v63  ;;  %v885_v4 = vmul.bf16 %v2736_v47, %v3024_v10  ;;  %v907_v22 = vunpack.c.l.bf16 %v883_v52 }
  0xa9   : > { %v1035_v59 = vmul.bf16 %v2748_v56, %v3012_v58  ;;  %v763_v2 = vsel %vm728_vm1, %v760_v43, %v762_v1  ;;  %v797_v35 = vadd.f32 %v761_v16, %v644_v54  ;;  %v1036_v5 = vmul.bf16 %v2748_v56, %v3014_v63 }
  0xaa   : > { %v1037_v3 = vmul.bf16 %v2748_v56, %v3024_v10  ;;  %v798_v41 = vadd.f32 %v763_v2, %v645_v0  ;;  %v908_v6 = vunpack.c.l.bf16 %v884_v21  ;;  %v909_v7 = vunpack.c.l.bf16 %v885_v4 }
  0xab   : > { %v967_v8 = vrot.slane %v907_v22, 1  ;;  %v853_v15 = vadd.f32 %v837_v46, %v797_v35  ;;  %v1059_v13 = vunpack.c.l.bf16 %v1035_v59  ;;  %v1060_v17 = vunpack.c.l.bf16 %v1036_v5 }
  0xac   : > { %v1061_v27 = vunpack.c.l.bf16 %v1037_v3  ;;  %v854_v20 = vadd.f32 %v838_v51, %v798_v41  ;;  %v968_v42 = vrot.slane %v908_v6, 1  ;;  %v970_v23 = vrot.slane %v909_v7, 1 }
  0xad   : > { %v1181_v24 = vmul.bf16 %v2738_v48, %v3138_v62  ;;  %v2437_v26 = vld [vmem:[#allocation3 + $0x10] sm:$0xff]   ;;  %v1119_v9 = vrot.slane %v1059_v13, 2  ;;  %v1182_v19 = vmul.bf16 %v2738_v48, %v3140_v18  ;;  %v1243_v28 = vmul.bf16 %v2750_v57, %v3138_v62 }
  0xae   : > { %v1244_v29 = vmul.bf16 %v2750_v57, %v3140_v18  ;;  %v969_v30 = vsel %vm575_vm0, %v967_v8, %v968_v42  ;;  %v971_v31 = vsel %vm575_vm0, %v968_v42, %v970_v23  ;;  %v1120_v32 = vrot.slane %v1060_v17, 2  ;;  %2321 = vmatprep.mubr.bf16.mxu0 %v2437_v26 }
  0xaf   : > { %v1122_v60 = vrot.slane %v1061_v27, 2  ;;  %v1005_v37 = vadd.f32 %v969_v30, %v853_v15  ;;  %v1006_v61 = vadd.f32 %v971_v31, %v854_v20  ;;  %v1197_v38 = vunpack.c.l.bf16 %v1181_v24 }
  0xb0   : > { %v1198_v14 = vunpack.c.l.bf16 %v1182_v19  ;;  %v1121_v11 = vsel %vm728_vm1, %v1119_v9, %v1120_v32  ;;  %v1245_v12 = vmul.bf16 %v2750_v57, %v3152_v36  ;;  %v1267_v43 = vunpack.c.l.bf16 %v1243_v28 }
  0xb1   : > { %v1123_v39 = vsel %vm728_vm1, %v1120_v32, %v1122_v60  ;;  %v1157_v46 = vadd.f32 %v1121_v11, %v1005_v37  ;;  %v1268_v33 = vunpack.c.l.bf16 %v1244_v29  ;;  %v1395_v51 = vmul.bf16 %v2740_v49, %v3138_v62 }
  0xb2   : > { %v1158_v50 = vadd.f32 %v1123_v39, %v1006_v61  ;;  %v1269_v52 = vunpack.c.l.bf16 %v1245_v12  ;;  %v1327_v54 = vrot.slane %v1267_v43, 1  ;;  %v1396_v0 = vmul.bf16 %v2740_v49, %v3140_v18  ;;  %v2441_v39 = vld [vmem:[#allocation2 + $0x30] sm:$0xf] }
  0xb3   : > { %v1397_v16 = vmul.bf16 %v2740_v49, %v3152_v36  ;;  %v1213_v1 = vadd.f32 %v1197_v38, %v1157_v46  ;;  %v1328_v4 = vrot.slane %v1268_v33, 1  ;;  %v1419_v22 = vunpack.c.l.bf16 %v1395_v51  ;;  %v2442_v33 = vld [vmem:[#allocation2 + $0x34] sm:$0xf] }
  0xb4   : > { %v1214_v21 = vadd.f32 %v1198_v14, %v1158_v50  ;;  %v1330_v59 = vrot.slane %v1269_v52, 1  ;;  %v1420_v2 = vunpack.c.l.bf16 %v1396_v0  ;;  %v450_v5 = vmul.bf16 %v2724_v40, %v2942_v25 }
  0xb5   : > { %v1421_v35 = vunpack.c.l.bf16 %v1397_v16  ;;  %v1329_v3 = vsel %vm575_vm0, %v1327_v54, %v1328_v4  ;;  %v1479_v41 = vrot.slane %v1419_v22, 2  ;;  %v451_v6 = vmul.bf16 %v2724_v40, %v2951_v34 }
  0xb6   : > { %v512_v7 = vmul.bf16 %v2727_v44, %v2942_v25  ;;  %v1331_v8 = vsel %vm575_vm0, %v1328_v4, %v1330_v59  ;;  %v1365_v15 = vadd.f32 %v1329_v3, %v1213_v1  ;;  %v1480_v13 = vrot.slane %v1420_v2, 2  ;;  %v2443_v59 = vld [vmem:[#allocation2 + $0x38] sm:$0x1] }
  0xb7   : > { %v1482_v17 = vrot.slane %v1421_v35, 2  ;;  %v1366_v27 = vadd.f32 %v1331_v8, %v1214_v21  ;;  %v466_v20 = vunpack.c.l.bf16 %v450_v5  ;;  %v467_v42 = vunpack.c.l.bf16 %v451_v6 }
  0xb8   : > { %v513_v23 = vmul.bf16 %v2727_v44, %v2951_v34  ;;  %v1481_v24 = vsel %vm728_vm1, %v1479_v41, %v1480_v13  ;;  %v514_v9 = vmul.bf16 %v2727_v44, %v2956_v53  ;;  %v536_v19 = vunpack.c.l.bf16 %v512_v7 }
  0xb9   : > { %v1483_v26 = vsel %vm728_vm1, %v1480_v13, %v1482_v17  ;;  %v1517_v28 = vadd.f32 %v1481_v24, %v1365_v15  ;;  %v665_v31 = vmul.bf16 %v2729_v45, %v2942_v25  ;;  %v666_v37 = vmul.bf16 %v2729_v45, %v2951_v34 }
  0xba   : > { %v1518_v29 = vadd.f32 %v1483_v26, %v1366_v27  ;;  %v537_v30 = vunpack.c.l.bf16 %v513_v23  ;;  %v538_v32 = vunpack.c.l.bf16 %v514_v9  ;;  %v591_v60 = vrot.slane %v536_v19, 1 }
  0xbb   : > { %v667_v61 = vmul.bf16 %v2729_v45, %v2956_v53  ;;  %v689_v11 = vunpack.c.l.bf16 %v665_v31  ;;  %v815_v12 = vmul.bf16 %v2441_v39, %v2746_v55  ;;  %v690_v46 = vunpack.c.l.bf16 %v666_v37  ;;  %v2445_v37 = vld [vmem:[#allocation2 + $0x40] sm:$0xf] }
  0xbc   : > { %v2222_v38 = vpack.c.bf16 %v1518_v29, %v1517_v28  ;;  %v592_v14 = vrot.slane %v537_v30, 1  ;;  %v594_v43 = vrot.slane %v538_v32, 1  ;;  %v816_v25 = vmul.bf16 %v2442_v33, %v2746_v55  ;;  %v2444_v30 = vld [vmem:[#allocation2 + $0x3c] sm:$0xf] }
  0xbd   : > { %v691_v50 = vunpack.c.l.bf16 %v667_v61  ;;  %v744_v52 = vrot.slane %v689_v11, 2  ;;  %v831_v34 = vunpack.c.l.bf16 %v815_v12  ;;  %v874_v54 = vmul.bf16 %v2441_v39, %v2736_v47 }
  0xbe   : > { %2276 = vst [vmem:[#allocation3 + $0x30] sm:$0xff] %v2222_v38   ;;  %v593_v51 = vsel %vm575_vm0, %v591_v60, %v592_v14  ;;  %v595_v53 = vsel %vm575_vm0, %v592_v14, %v594_v43  ;;  %v745_v16 = vrot.slane %v690_v46, 2  ;;  %v832_v4 = vunpack.c.l.bf16 %v816_v25 }
  0xbf   : > { %v638_v0 = vadd.f32 %v593_v51, %v466_v20  ;;  %v747_v1 = vrot.slane %v691_v50, 2  ;;  %v639_v21 = vadd.f32 %v595_v53, %v467_v42  ;;  %v875_v22 = vmul.bf16 %v2442_v33, %v2736_v47 }
  0xc0   : > { %v876_v2 = vmul.bf16 %v2443_v59, %v2736_v47  ;;  %v746_v35 = vsel %vm728_vm1, %v744_v52, %v745_v16  ;;  %v898_v3 = vunpack.c.l.bf16 %v874_v54  ;;  %v1026_v41 = vmul.bf16 %v2441_v39, %v2748_v56 }
  0xc1   : > { %v748_v5 = vsel %vm728_vm1, %v745_v16, %v747_v1  ;;  %v791_v6 = vadd.f32 %v746_v35, %v638_v0  ;;  %v899_v8 = vunpack.c.l.bf16 %v875_v22  ;;  %v1027_v17 = vmul.bf16 %v2442_v33, %v2748_v56  ;;  %v2446_v33 = vld [vmem:[#allocation2 + $0x44] sm:$0x1] }
  0xc2   : > { %v792_v7 = vadd.f32 %v748_v5, %v639_v21  ;;  %v900_v15 = vunpack.c.l.bf16 %v876_v2  ;;  %v952_v13 = vrot.slane %v898_v3, 1  ;;  %v1028_v27 = vmul.bf16 %v2443_v59, %v2748_v56 }
  0xc3   : > { %v1050_v20 = vunpack.c.l.bf16 %v1026_v41  ;;  %v847_v42 = vadd.f32 %v831_v34, %v791_v6  ;;  %v953_v24 = vrot.slane %v899_v8, 1  ;;  %v1051_v19 = vunpack.c.l.bf16 %v1027_v17 }
  0xc4   : > { %v848_v23 = vadd.f32 %v832_v4, %v792_v7  ;;  %v955_v26 = vrot.slane %v900_v15, 1  ;;  %v1052_v28 = vunpack.c.l.bf16 %v1028_v27  ;;  %v1175_v31 = vmul.bf16 %v2444_v30, %v2738_v48 }
  0xc5   : > { %v2438_v9 = vld [vmem:[#allocation3 + $0x30] sm:$0xff]   ;;  %v1104_v29 = vrot.slane %v1050_v20, 2  ;;  %v954_v32 = vsel %vm575_vm0, %v952_v13, %v953_v24  ;;  %v1176_v61 = vmul.bf16 %v2445_v37, %v2738_v48  ;;  %v1234_v38 = vmul.bf16 %v2444_v30, %v2750_v57 }
  0xc6   : > { %v956_v60 = vsel %vm575_vm0, %v953_v24, %v955_v26  ;;  %2329 = vmatprep.mubr.bf16.mxu1 %v2438_v9  ;;  %v999_v14 = vadd.f32 %v954_v32, %v847_v42  ;;  %v1105_v39 = vrot.slane %v1051_v19, 2  ;;  %v1107_v12 = vrot.slane %v1052_v28, 2 }
  0xc7   : > { %v1000_v11 = vadd.f32 %v956_v60, %v848_v23  ;;  %v1191_v43 = vunpack.c.l.bf16 %v1175_v31  ;;  %v1192_v46 = vunpack.c.l.bf16 %v1176_v61  ;;  %v1235_v50 = vmul.bf16 %v2445_v37, %v2750_v57 }
  0xc8   : > { %v1236_v25 = vmul.bf16 %v2446_v33, %v2750_v57  ;;  %v1106_v51 = vsel %vm728_vm1, %v1104_v29, %v1105_v39  ;;  %v1108_v52 = vsel %vm728_vm1, %v1105_v39, %v1107_v12  ;;  %v1258_v34 = vunpack.c.l.bf16 %v1234_v38 }
  0xc9   : > { %v1386_v54 = vmul.bf16 %v2444_v30, %v2740_v49  ;;  %v1151_v53 = vadd.f32 %v1106_v51, %v999_v14  ;;  %v1152_v0 = vadd.f32 %v1108_v52, %v1000_v11  ;;  %v1259_v16 = vunpack.c.l.bf16 %v1235_v50 }
  0xca   : > { %v1260_v1 = vunpack.c.l.bf16 %v1236_v25  ;;  %v1312_v21 = vrot.slane %v1258_v34, 1  ;;  %v1387_v4 = vmul.bf16 %v2445_v37, %v2740_v49  ;;  %v1388_v22 = vmul.bf16 %v2446_v33, %v2740_v49 }
  0xcb   : > { %v1410_v59 = vunpack.c.l.bf16 %v1386_v54  ;;  %v1207_v2 = vadd.f32 %v1191_v43, %v1151_v53  ;;  %v1208_v35 = vadd.f32 %v1192_v46, %v1152_v0  ;;  %v1313_v5 = vrot.slane %v1259_v16, 1 }
  0xcc   : > { %v1315_v3 = vrot.slane %v1260_v1, 1  ;;  %v1411_v41 = vunpack.c.l.bf16 %v1387_v4  ;;  %v1412_v6 = vunpack.c.l.bf16 %v1388_v22  ;;  %v458_v8 = vmul.bf16 %v2724_v40, %v3012_v58 }
  0xcd   : > { %v1464_v7 = vrot.slane %v1410_v59, 2  ;;  %v1314_v15 = vsel %vm575_vm0, %v1312_v21, %v1313_v5  ;;  %v459_v17 = vmul.bf16 %v2724_v40, %v3014_v63  ;;  %v524_v27 = vmul.bf16 %v2727_v44, %v3012_v58 }
  0xce   : > { %v1316_v13 = vsel %vm575_vm0, %v1313_v5, %v1315_v3  ;;  %v1359_v20 = vadd.f32 %v1314_v15, %v1207_v2  ;;  %v1465_v23 = vrot.slane %v1411_v41, 2  ;;  %v1467_v24 = vrot.slane %v1412_v6, 2  ;;  %v430_v2 = vld [vmem:[#allocation2 + $0x6c] sm:$0xf] }
  0xcf   : > { %v1360_v42 = vadd.f32 %v1316_v13, %v1208_v35  ;;  %v474_v26 = vunpack.c.l.bf16 %v458_v8  ;;  %v475_v9 = vunpack.c.l.bf16 %v459_v17  ;;  %v525_v19 = vmul.bf16 %v2727_v44, %v3014_v63  ;;  %v431_v35 = vld [vmem:[#allocation2 + $0x70] sm:$0xf]  ;;  %v432_v13 = vld [vmem:[#allocation2 + $0x74] sm:$0x1] }
  0xd0   : > { %v526_v28 = vmul.bf16 %v2727_v44, %v3024_v10  ;;  %v1466_v29 = vsel %vm728_vm1, %v1464_v7, %v1465_v23  ;;  %v1468_v30 = vsel %vm728_vm1, %v1465_v23, %v1467_v24  ;;  %v548_v40 = vunpack.c.l.bf16 %v524_v27 }
  0xd1   : > { %v677_v31 = vmul.bf16 %v2729_v45, %v3012_v58  ;;  %v1511_v32 = vadd.f32 %v1466_v29, %v1359_v20  ;;  %v1512_v60 = vadd.f32 %v1468_v30, %v1360_v42  ;;  %v549_v37 = vunpack.c.l.bf16 %v525_v19 }
  0xd2   : > { %v550_v61 = vunpack.c.l.bf16 %v526_v28  ;;  %v611_v38 = vrot.slane %v548_v40, 1  ;;  %v678_v14 = vmul.bf16 %v2729_v45, %v3014_v63  ;;  %v679_v11 = vmul.bf16 %v2729_v45, %v3024_v10 }
  0xd3   : > { %v701_v44 = vunpack.c.l.bf16 %v677_v31  ;;  %v2207_v39 = vpack.c.bf16 %v1512_v60, %v1511_v32  ;;  %v612_v12 = vrot.slane %v549_v37, 1  ;;  %v823_v46 = vmul.bf16 %v2746_v55, %v3138_v62 }
  0xd4   : > { %v614_v43 = vrot.slane %v550_v61, 1  ;;  %v702_v50 = vunpack.c.l.bf16 %v678_v14  ;;  %v703_v58 = vunpack.c.l.bf16 %v679_v11  ;;  %v824_v25 = vmul.bf16 %v2746_v55, %v3140_v18 }
  0xd5   : > { %v764_v33 = vrot.slane %v701_v44, 2  ;;  %2273 = vst [vmem:[#allocation3 + $0x18] sm:$0xff] %v2207_v39   ;;  %v613_v51 = vsel %vm575_vm0, %v611_v38, %v612_v12  ;;  %v839_v52 = vunpack.c.l.bf16 %v823_v46  ;;  %v886_v45 = vmul.bf16 %v2736_v47, %v3138_v62 }
  0xd6   : > { %v615_v63 = vsel %vm575_vm0, %v612_v12, %v614_v43  ;;  %v646_v10 = vadd.f32 %v613_v51, %v474_v26  ;;  %v765_v54 = vrot.slane %v702_v50, 2  ;;  %v767_v53 = vrot.slane %v703_v58, 2 }
  0xd7   : > { %v647_v34 = vadd.f32 %v615_v63, %v475_v9  ;;  %v840_v0 = vunpack.c.l.bf16 %v824_v25  ;;  %v887_v16 = vmul.bf16 %v2736_v47, %v3140_v18  ;;  %v888_v55 = vmul.bf16 %v2736_v47, %v3152_v36 }
  0xd8   : > { %v910_v1 = vunpack.c.l.bf16 %v886_v45  ;;  %v766_v21 = vsel %vm728_vm1, %v764_v33, %v765_v54  ;;  %v768_v4 = vsel %vm728_vm1, %v765_v54, %v767_v53  ;;  %v1038_v22 = vmul.bf16 %v2748_v56, %v3138_v62 }
  0xd9   : > { %v1039_v59 = vmul.bf16 %v2748_v56, %v3140_v18  ;;  %v799_v5 = vadd.f32 %v766_v21, %v646_v10  ;;  %v800_v3 = vadd.f32 %v768_v4, %v647_v34  ;;  %v911_v41 = vunpack.c.l.bf16 %v887_v16 }
  0xda   : > { %v912_v6 = vunpack.c.l.bf16 %v888_v55  ;;  %v972_v7 = vrot.slane %v910_v1, 1  ;;  %v1040_v47 = vmul.bf16 %v2748_v56, %v3152_v36  ;;  %v1062_v8 = vunpack.c.l.bf16 %v1038_v22  ;;  %v3267_v22 = vld [vmem:[%s3365_s4] ss:$0 sm:$0xff] }
  0xdb   : > { %v1063_v15 = vunpack.c.l.bf16 %v1039_v59  ;;  %v855_v17 = vadd.f32 %v839_v52, %v799_v5  ;;  %v856_v27 = vadd.f32 %v840_v0, %v800_v3  ;;  %v973_v20 = vrot.slane %v911_v41, 1 }
  0xdc   : > { %v975_v62 = vrot.slane %v912_v6, 1  ;;  %v2439_v42 = vld [vmem:[#allocation3 + $0x18] sm:$0xff]   ;;  %v1064_v23 = vunpack.c.l.bf16 %v1040_v47  ;;  %v1124_v18 = vrot.slane %v1062_v8, 2  ;;  %v1183_v24 = vmul.bf16 %v2738_v48, %v430_v2 }
  0xdd   : > { %v1184_v26 = vmul.bf16 %v2738_v48, %v431_v35  ;;  %v974_v9 = vsel %vm575_vm0, %v972_v7, %v973_v20  ;;  %v1125_v28 = vrot.slane %v1063_v15, 2  ;;  %v1246_v56 = vmul.bf16 %v2750_v57, %v430_v2  ;;  %2322 = vmatmul.mubr.bf16.gmra.mxu0 %v2439_v42 }
  0xde   : > { %v976_v19 = vsel %vm575_vm0, %v973_v20, %v975_v62  ;;  %v1007_v36 = vadd.f32 %v974_v9, %v855_v17  ;;  %v1127_v30 = vrot.slane %v1064_v23, 2  ;;  %v1199_v40 = vunpack.c.l.bf16 %v1183_v24 }
  0xdf   : > { %v1008_v29 = vadd.f32 %v976_v19, %v856_v27  ;;  %v1126_v31 = vsel %vm728_vm1, %v1124_v18, %v1125_v28  ;;  %v1200_v32 = vunpack.c.l.bf16 %v1184_v26  ;;  %v1247_v60 = vmul.bf16 %v2750_v57, %v431_v35 }
  0xe0   : > { %v1248_v37 = vmul.bf16 %v2750_v57, %v432_v13  ;;  %v1128_v48 = vsel %vm728_vm1, %v1125_v28, %v1127_v30  ;;  %v1159_v61 = vadd.f32 %v1126_v31, %v1007_v36  ;;  %v1270_v38 = vunpack.c.l.bf16 %v1246_v56 }
  0xe1   : > { %v1398_v14 = vmul.bf16 %v2740_v49, %v430_v2  ;;  %v1160_v11 = vadd.f32 %v1128_v48, %v1008_v29  ;;  %v1271_v44 = vunpack.c.l.bf16 %v1247_v60  ;;  %v1399_v12 = vmul.bf16 %v2740_v49, %v431_v35 }
  0xe2   : > { %v1272_v39 = vunpack.c.l.bf16 %v1248_v37  ;;  %v1215_v43 = vadd.f32 %v1199_v40, %v1159_v61  ;;  %v1332_v46 = vrot.slane %v1270_v38, 1  ;;  %v1400_v50 = vmul.bf16 %v2740_v49, %v432_v13 }
  0xe3   : > { %v1422_v58 = vunpack.c.l.bf16 %v1398_v14  ;;  %v1216_v33 = vadd.f32 %v1200_v32, %v1160_v11  ;;  %v1333_v25 = vrot.slane %v1271_v44, 1  ;;  %v1423_v57 = vunpack.c.l.bf16 %v1399_v12 }
  0xe4   : > { %v1335_v51 = vrot.slane %v1272_v39, 1  ;;  %v1424_v63 = vunpack.c.l.bf16 %v1400_v50 }
  0xe5   : > { %v1484_v52 = vrot.slane %v1422_v58, 2  ;;  %v1334_v45 = vsel %vm575_vm0, %v1332_v46, %v1333_v25  ;;  %v1485_v34 = vrot.slane %v1423_v57, 2 }
  0xe6   : > { %v1336_v10 = vsel %vm575_vm0, %v1333_v25, %v1335_v51  ;;  %v1367_v54 = vadd.f32 %v1334_v45, %v1215_v43  ;;  %v1487_v0 = vrot.slane %v1424_v63, 2 }
  0xe7   : > { %v1368_v53 = vadd.f32 %v1336_v10, %v1216_v33  ;;  %v1486_v16 = vsel %vm728_vm1, %v1484_v52, %v1485_v34 }
  0xe8   : > { %v1488_v49 = vsel %vm728_vm1, %v1485_v34, %v1487_v0  ;;  %v1519_v55 = vadd.f32 %v1486_v16, %v1367_v54 }
  0xe9   : > { %v1520_v1 = vadd.f32 %v1488_v49, %v1368_v53 }
  0xeb   : > { %v2227_v21 = vpack.c.bf16 %v1520_v1, %v1519_v55 }
  0xed   : > { %2277 = vst [vmem:[#allocation3 + $0x38] sm:$0xff] %v2227_v21  }
  0xf4   : > { %v2440_v4 = vld [vmem:[#allocation3 + $0x38] sm:$0xff]  }
  0xf5   : > { %2330 = vmatmul.mubr.bf16.gmra.mxu1 %v2440_v4 }
 0x13e   : > { %v2319_v59 = vpop.f32.mrf.mxu0 }
 0x13f   : > { %v1782_v2 = vadd.f32 %v2319_v59, %v3267_v22 }
 0x140   : > { %v1773_v35 = vpop.f32.mrf.mxu0 }
 0x141   : > { %v1774_v5 = vadd.f32 %v3267_v22, %v1773_v35  ;;  %v1838_v41 = vmax.f32 %v1782_v2, 0.0 }
 0x142   : > { %v2320_v3 = vpop.f32.mrf.mxu0 }
 0x143   : > { %v1785_v6 = vadd.f32 %v2320_v3, %v3267_v22  ;;  %v1836_v47 = vmax.f32 %v1774_v5, 0.0  ;;  %v1854_v13 = vmin.f32 %v1838_v41, 6.0 }
 0x144   : > { %v1776_v7 = vpop.f32.mrf.mxu0 }
 0x145   : > { %v1839_v8 = vmax.f32 %v1785_v6, 0.0  ;;  %v1777_v15 = vadd.f32 %v3267_v22, %v1776_v7  ;;  %v1852_v20 = vmin.f32 %v1836_v47, 6.0 }
 0x147   : > { %v1855_v17 = vmin.f32 %v1839_v8, 6.0  ;;  %v1837_v27 = vmax.f32 %v1777_v15, 0.0 }
 0x149   : > { %v2237_v62 = vpack.c.bf16 %v1855_v17, %v1854_v13  ;;  %v1853_v42 = vmin.f32 %v1837_v27, 6.0 }
 0x14b   : > { %2278 = vst [vmem:[%s3276_s14 + $0x8] sm:$0xff] %v2237_v62   ;;  %v2232_v23 = vpack.c.bf16 %v1853_v42, %v1852_v20 }
 0x14d   : > { %2233 = vst [vmem:[%s3276_s14] sm:$0xff] %v2232_v23  }
 0x156   : > { %v2327_v18 = vpop.f32.mrf.mxu1 }
 0x157   : > { %v1814_v24 = vadd.f32 %v2327_v18, %v3267_v22 }
 0x158   : > { %v1805_v26 = vpop.f32.mrf.mxu1 }
 0x159   : > { %v1806_v9 = vadd.f32 %v3267_v22, %v1805_v26  ;;  %v1846_v28 = vmax.f32 %v1814_v24, 0.0 }
 0x15a   : > { %v2328_v19 = vpop.f32.mrf.mxu1 }
 0x15b   : > { %v1817_v56 = vadd.f32 %v2328_v19, %v3267_v22  ;;  %v1844_v29 = vmax.f32 %v1806_v9, 0.0  ;;  %v1862_v31 = vmin.f32 %v1846_v28, 6.0 }
 0x15c   : > { %v1808_v36 = vpop.f32.mrf.mxu1 }
 0x15d   : > { %v1847_v30 = vmax.f32 %v1817_v56, 0.0  ;;  %v1809_v40 = vadd.f32 %v3267_v22, %v1808_v36  ;;  %v1860_v37 = vmin.f32 %v1844_v29, 6.0 }
 0x15f   : > { %v1863_v32 = vmin.f32 %v1847_v30, 6.0  ;;  %v1845_v60 = vmax.f32 %v1809_v40, 0.0 }
 0x161   : > { %v2257_v48 = vpack.c.bf16 %v1863_v32, %v1862_v31  ;;  %v1861_v61 = vmin.f32 %v1845_v60, 6.0 }
 0x163   : > { %2282 = vst [vmem:[%s3276_s14 + $0x28] sm:$0xff] %v2257_v48   ;;  %v2252_v38 = vpack.c.bf16 %v1861_v61, %v1860_v37 }
 0x165   : > { %2281 = vst [vmem:[%s3276_s14 + $0x20] sm:$0xff] %v2252_v38  }
 0x19d   : > { %v2323_v14 = vpop.f32.mrf.mxu0 }
 0x19e   : > { %v1798_v11 = vadd.f32 %v2323_v14, %v3267_v22 }
 0x19f   : > { %v1789_v44 = vpop.f32.mrf.mxu0 }
 0x1a0   : > { %v1790_v39 = vadd.f32 %v3267_v22, %v1789_v44  ;;  %v1842_v43 = vmax.f32 %v1798_v11, 0.0 }
 0x1a1   : > { %v2324_v12 = vpop.f32.mrf.mxu0 }
 0x1a2   : > { %v1801_v46 = vadd.f32 %v2324_v12, %v3267_v22  ;;  %v1840_v58 = vmax.f32 %v1790_v39, 0.0  ;;  %v1858_v51 = vmin.f32 %v1842_v43, 6.0 }
 0x1a3   : > { %v1792_v50 = vpop.f32.mrf.mxu0 }
 0x1a4   : > { %v1843_v33 = vmax.f32 %v1801_v46, 0.0  ;;  %v1793_v25 = vadd.f32 %v3267_v22, %v1792_v50  ;;  %v1856_v52 = vmin.f32 %v1840_v58, 6.0 }
 0x1a6   : > { %v1859_v57 = vmin.f32 %v1843_v33, 6.0  ;;  %v1841_v63 = vmax.f32 %v1793_v25, 0.0 }
 0x1a8   : > { %v2247_v45 = vpack.c.bf16 %v1859_v57, %v1858_v51  ;;  %v1857_v10 = vmin.f32 %v1841_v63, 6.0 }
 0x1aa   : > { %2280 = vst [vmem:[%s3276_s14 + $0x18] sm:$0xff] %v2247_v45   ;;  %v2242_v34 = vpack.c.bf16 %v1857_v10, %v1856_v52 }
 0x1ac   : > { %2279 = vst [vmem:[%s3276_s14 + $0x10] sm:$0xff] %v2242_v34  }
 0x1b5   : > { %v2331_v54 = vpop.f32.mrf.mxu1 }
 0x1b6   : > { %v1830_v53 = vadd.f32 %v2331_v54, %v3267_v22 }
 0x1b7   : > { %v1821_v0 = vpop.f32.mrf.mxu1 }
 0x1b8   : > { %v1822_v16 = vadd.f32 %v3267_v22, %v1821_v0  ;;  %v1850_v55 = vmax.f32 %v1830_v53, 0.0 }
 0x1b9   : > { %v2332_v49 = vpop.f32.mrf.mxu1 }
 0x1ba   : > { %v1833_v1 = vadd.f32 %v2332_v49, %v3267_v22  ;;  %v1848_v4 = vmax.f32 %v1822_v16, 0.0  ;;  %v1866_v35 = vmin.f32 %v1850_v55, 6.0 }
 0x1bb   : > { %v1824_v21 = vpop.f32.mrf.mxu1 }
 0x1bc   : > { %v1851_v59 = vmax.f32 %v1833_v1, 0.0  ;;  %v1825_v2 = vadd.f32 %v3267_v22, %v1824_v21  ;;  %v1864_v41 = vmin.f32 %v1848_v4, 6.0 }
 0x1be   : > { %v1867_v5 = vmin.f32 %v1851_v59, 6.0  ;;  %v1849_v3 = vmax.f32 %v1825_v2, 0.0 }
 0x1c0   : > { %v2267_v6 = vpack.c.bf16 %v1867_v5, %v1866_v35  ;;  %v1865_v7 = vmin.f32 %v1849_v3, 6.0 }
 0x1c2   : > { %2284 = vst [vmem:[%s3276_s14 + $0x38] sm:$0xff] %v2267_v6   ;;  %v2262_v22 = vpack.c.bf16 %v1865_v7, %v1864_v41 }
 0x1c4   : > { %2283 = vst [vmem:[%s3276_s14 + $0x30] sm:$0xff] %v2262_v22  }
 0x1c5   : > { %2460 = shalt.err (!%p2457_p9)
}
 0x1c6   : > { %s2461_s28 = scalar_lea.hbm %s3302_s30, 1024  ;;  %s2465_s13 = scalar_lea.hbm %s3366_s5, 4096 }
 0x1c7   : > { %p2462_p10 = scmp.ne.s32.totalorder %s3302_s30, %s2461_s28  ;;  %p2466_p13 = scmp.lt.s32.totalorder %s3302_s30, %s3366_s5 }
 0x1c8   : > { %p2467_p0 = scmp.lt.s32.totalorder %s2465_s13, %s2461_s28 }
 0x1c9   : > { %p2463_p11 = pnand %p2462_p10, %p2625_p3 }
 0x1ca   : > { %p2468_p1 = por %p2467_p0, %p2466_p13 }
 0x1cb   : > { %p2464_p12 = pneg %p2463_p11 }
 0x1cd   : > { %p2469_p2 = pnand %p2468_p1, %p2464_p12 }
 0x1cf   : > { %2472 = shalt.err (!%p2469_p2)
}
 0x1d0   : > { %s2542_s8 = smov 64   ;;  %s2543_s22 = smov 4  }
 0x1d1   : > { %2352 = dma.vmem_to_hbm [thread:$0]  (%p2625_p3), %s3304_s21, 1024, %s3302_s30, %s3310_s10, %s2542_s8, %s2542_s8, %s2543_s22  }
 0x1d2 PF: > { %p2358_p4 = scmp.ge.s32.totalorder %s2539_s25, 2  ;;  %s1980_s27 = sand.u32 1, %s2511_s18  }
 0x1d3   : > { %s1981_s12 = scalar_lea.sflag [#allocation5], %s1980_s27 }
 0x1d4   : > { %p2355_p5 = pnand %p2358_p4, %p2634_p8 }
 0x1d6   : > { %p2356_p6 = pneg %p2355_p5 }
 0x1d8   : > { %2506 = dma.done.wait (%p2356_p6), %s1981_s12, 1024  }
 0x1d9   : > { %2508 = vsyncadd (%p2356_p6), %s1981_s12, 4294966272  ;;  %s18_s25 = sadd.s32 1, %s2539_s25   ;;  %s3374_s6 = sld [smem:[#allocation7_spill]] }
 0x1da   : > { %p15_p7 = scmp.ge.s32.totalorder %s18_s25, 6   ;;  %s3375_s30 = sld [smem:[#allocation8_spill]] }
 0x1db   : > { %s3376_s18 = smov %s2515_s19  ;;  %s3377_s19 = smov %s2519_s20 }
 0x1dc   : > { %s3378_s20 = smov %s2643_s11  ;;  %s3379_s21 = smov %s2531_s23 }
 0x1dd   : > { %s3380_s22 = smov %s2535_s24  ;;  %17 = sbr.rel (!%p15_p7) target bundleno = 5 (0x5), region = 81 }
 0x1df   : > { %s3381_s23 = smov %s3374_s6 }
 0x1e0   : > { %s3382_s24 = smov %s3375_s30 }
 0x1e2   :  { %1986 = vsyncpa [#allocation5], 1 }
 0x1e3   :  { %1988 = vsyncpa [#allocation5 + $0x1], 1 }

</bundles_post_ra>
